<compile_context>
chip_gen: v5e
topology: v5e:2x2
jax: 0.10.0
libtpu: 0.0.40
codegen_flags: <defaults>
</compile_context>

<pallas_src>
import jax
import jax.numpy as jnp
from jax.experimental import pallas as pl
from jax.experimental.pallas import tpu as pltpu


def gct_kernel(x2_ref, h0_ref, wih_ref, whh_ref, bias_ref, fcw_ref, fcb_ref,
               out_ref, hid_ref):
    """Whole GRU recurrence + final Linear in one kernel invocation.

    x2_ref  : (S*Bp, H)     embedded inputs (bf16), flattened over time
    h0_ref  : (Bp, Hp)      initial hidden, lane-padded to Hp=128 (f32)
    wih_ref : (H, 3*Hp)     [W_ir | W_iz | W_in], 128-lane gate blocks (bf16)
    whh_ref : (Hp, 3*Hp)    [W_hr | W_hz | W_hn], 128-lane gate blocks (bf16)
    bias_ref: (2, 3*Hp)     row0 = [b_ir+b_hr | b_iz+b_hz | b_in], row1 = [0|0|b_hn]
    fcw_ref : (Hp, Op)      FC weight, lane-dense output slab (bf16)
    fcb_ref : (1, Op)       FC bias (f32)
    out_ref : (S*Bp, Op)    projected output (f32, lane-dense)
    hid_ref : (Bp, Hp)      final hidden state (f32)
    """
    Bp, Hp = h0_ref.shape
    SB = x2_ref.shape[0]
    S = SB // Bp

    # Fused, time-independent input projection: one wide MXU pass + one bias add.
    gi = jnp.dot(x2_ref[...], wih_ref[...],
                 preferred_element_type=jnp.float32) + bias_ref[0:1, :]
    b_hn = bias_ref[1:2, 2 * Hp:]            # (1, Hp) whole-vreg slice
    whh = whh_ref[...]                       # (Hp, 3*Hp) bf16

    # Serial recurrence, fully unrolled (S is a small static constant).
    # One fused (Bp,Hp)@(Hp,3Hp) MXU dot per step; gate math stays in f32.
    h = h0_ref[...]                          # (Bp, Hp) f32, padded lanes are 0
    hs = []
    for t in range(S):
        lo = t * Bp
        gh = jnp.dot(h.astype(whh.dtype), whh,
                     preferred_element_type=jnp.float32)        # (Bp, 3*Hp)
        # Fused sigmoid over the contiguous r|z region (single EUP push).
        rz = jax.nn.sigmoid(gi[lo:lo + Bp, :2 * Hp] + gh[:, :2 * Hp])
        r = rz[:, :Hp]
        z = rz[:, Hp:]
        n = jnp.tanh(gi[lo:lo + Bp, 2 * Hp:] + r * (gh[:, 2 * Hp:] + b_hn))
        h = (1.0 - z) * n + z * h
        hs.append(h)

    # Final hidden: written exactly once, after the loop.
    hid_ref[...] = h

    # Deferred FC: one (S*Bp, Hp) @ (Hp, Op) matmul, one lane-dense store.
    hs_all = jnp.concatenate(hs, axis=0).astype(fcw_ref.dtype)
    out_ref[...] = (jnp.dot(hs_all, fcw_ref[...],
                            preferred_element_type=jnp.float32) + fcb_ref[...])


def prepare_params(params):
    """One-time parameter preprocessing (off the per-call hot path)."""
    emb, w_ih, w_hh, b_ih, b_hh, fc_w, fc_b = (
        params["embedding"], params["w_ih"], params["w_hh"],
        params["b_ih"], params["b_hh"], params["fc_w"], params["fc_b"])
    H = emb.shape[1]
    O = fc_w.shape[1]
    Hp = ((H + 127) // 128) * 128            # 128-lane gate blocks
    Op = ((O + 127) // 128) * 128            # lane-dense output slab

    def pad_cols(x, w):
        return jnp.pad(x, ((0, 0), (0, w - x.shape[1])))

    # Gate blocks (torch order r, z, n), each padded to its own 128-lane block.
    wih_cat = jnp.concatenate(
        [pad_cols(w_ih[:, g * H:(g + 1) * H], Hp) for g in range(3)], axis=1)
    whh_cat = jnp.concatenate(
        [pad_cols(w_hh[:, g * H:(g + 1) * H], Hp) for g in range(3)], axis=1)
    whh_cat = jnp.pad(whh_cat, ((0, Hp - H), (0, 0)))          # (Hp, 3*Hp)

    # Bias slab: row0 = folded gi biases (b_ih + b_hh for r/z, b_in for n),
    # row1 = [0 | 0 | b_hn] (added to the recurrent n-gate term each step).
    row0 = jnp.concatenate(
        [pad_cols(b_ih[:, 0:H] + b_hh[:, 0:H], Hp),
         pad_cols(b_ih[:, H:2 * H] + b_hh[:, H:2 * H], Hp),
         pad_cols(b_ih[:, 2 * H:3 * H], Hp)], axis=1)
    row1 = jnp.concatenate(
        [jnp.zeros((1, 2 * Hp), jnp.float32),
         pad_cols(b_hh[:, 2 * H:3 * H], Hp)], axis=1)
    bias_cat = jnp.concatenate([row0, row1], axis=0)            # (2, 3*Hp)

    fc_w_p = jnp.pad(fc_w, ((0, Hp - H), (0, Op - O)))          # (Hp, Op)
    fc_b_p = jnp.pad(fc_b, ((0, 0), (0, Op - O)))               # (1, Op)

    return {
        "emb": emb.astype(jnp.bfloat16),                        # gather -> bf16 x2
        "wih_cat": wih_cat.astype(jnp.bfloat16),
        "whh_cat": whh_cat.astype(jnp.bfloat16),
        "bias_cat": bias_cat.astype(jnp.float32),
        "fc_w_p": fc_w_p.astype(jnp.bfloat16),
        "fc_b_p": fc_b_p.astype(jnp.float32),
        "H": H, "Hp": Hp, "O": O, "Op": Op,
    }


def gct_forward(tokens, hidden, prep):
    """Pallas implementation of GCT.forward(input_text, hidden)."""
    S, B = tokens.shape
    H, Hp, O, Op = prep["H"], prep["Hp"], prep["O"], prep["Op"]
    Bp = max(8, ((B + 7) // 8) * 8)          # full sublane group

    # Per-call glue: embedding lookup (gather) + batch/lane padding.
    x_emb = jnp.take(prep["emb"], tokens, axis=0)               # (S, B, H) bf16
    x_emb = jnp.pad(x_emb, ((0, 0), (0, Bp - B), (0, 0)))       # (S, Bp, H)
    x2 = x_emb.reshape(S * Bp, H)                               # (S*Bp, H)
    h0 = jnp.pad(hidden[0].astype(jnp.float32),
                 ((0, Bp - B), (0, Hp - H)))                    # (Bp, Hp)

    full = lambda shape: pl.BlockSpec(shape, lambda i: (0,) * len(shape))

    grid_spec = pltpu.PrefetchScalarGridSpec(
        num_scalar_prefetch=0,
        grid=(1,),
        in_specs=[
            full((S * Bp, H)),       # x2
            full((Bp, Hp)),          # h0
            full((H, 3 * Hp)),       # wih slab
            full((Hp, 3 * Hp)),      # whh slab
            full((2, 3 * Hp)),       # bias slab
            full((Hp, Op)),          # fc_w padded
            full((1, Op)),           # fc_b padded
        ],
        out_specs=[
            full((S * Bp, Op)),      # output slab (lane-dense)
            full((Bp, Hp)),          # final hidden
        ],
    )

    out_pad, hid_p = pl.pallas_call(
        gct_kernel,
        out_shape=(jax.ShapeDtypeStruct((S * Bp, Op), jnp.float32),
                   jax.ShapeDtypeStruct((Bp, Hp), jnp.float32)),
        grid_spec=grid_spec,
        compiler_params=pltpu.CompilerParams(
            dimension_semantics=("arbitrary",)),
    )(x2, h0, prep["wih_cat"], prep["whh_cat"], prep["bias_cat"],
      prep["fc_w_p"], prep["fc_b_p"])

    # Undo padding (free layout plumbing in the wrapper).
    out = out_pad.reshape(S, Bp, Op)[:, :B, :O]
    hid = hid_p[None, :B, :H]
    return out, hid


def gct_reference(tokens, hidden, params):
    """Pure-JAX f32 reference (mirrors torch: Embedding -> GRU -> Linear)."""
    emb, w_ih, w_hh, b_ih, b_hh, fc_w, fc_b = (
        params["embedding"], params["w_ih"], params["w_hh"],
        params["b_ih"], params["b_hh"], params["fc_w"], params["fc_b"])
    H = emb.shape[1]
    x_emb = jnp.take(emb, tokens, axis=0)          # (S, B, H)
    h0 = hidden[0]                                 # (B, H)

    def step(h_prev, x):
        gi = x @ w_ih + b_ih[0]
        gh = h_prev @ w_hh + b_hh[0]
        r = jax.nn.sigmoid(gi[:, 0:H] + gh[:, 0:H])
        z = jax.nn.sigmoid(gi[:, H:2 * H] + gh[:, H:2 * H])
        n = jnp.tanh(gi[:, 2 * H:3 * H] + r * gh[:, 2 * H:3 * H])
        h = (1.0 - z) * n + z * h_prev
        return h, h

    h_last, hs = jax.lax.scan(step, h0, x_emb)
    out = hs @ fc_w + fc_b[0]
    return out, h_last[None]


def init_params(key, input_size, hidden_size, output_size):
    """Deterministic synthetic parameters (same shapes as the torch module)."""
    ks = jax.random.split(key, 7)
    k = 1.0 / jnp.sqrt(hidden_size)
    # Stored pre-transposed for x @ W; gate order (r, z, n) along the 3H axis.
    return {
        "embedding": jax.random.normal(ks[0], (input_size, hidden_size), jnp.float32),
        "w_ih": jax.random.uniform(ks[1], (hidden_size, 3 * hidden_size),
                                   jnp.float32, -k, k),
        "w_hh": jax.random.uniform(ks[2], (hidden_size, 3 * hidden_size),
                                   jnp.float32, -k, k),
        "b_ih": jax.random.uniform(ks[3], (1, 3 * hidden_size), jnp.float32, -k, k),
        "b_hh": jax.random.uniform(ks[4], (1, 3 * hidden_size), jnp.float32, -k, k),
        "fc_w": jax.random.uniform(ks[5], (hidden_size, output_size),
                                   jnp.float32, -k, k),
        "fc_b": jax.random.uniform(ks[6], (1, output_size), jnp.float32, -k, k),
    }


if __name__ == "__main__":
    INPUT_SIZE = 50     # vocab size
    HIDDEN_SIZE = 32
    OUTPUT_SIZE = 16
    SEQ_LEN = 8
    BATCH = 4

    key = jax.random.PRNGKey(0)
    k_par, k_tok = jax.random.split(key)
    params = init_params(k_par, INPUT_SIZE, HIDDEN_SIZE, OUTPUT_SIZE)
    prepared = prepare_params(params)          # one-time, off the hot path

    tokens = jax.random.randint(k_tok, (SEQ_LEN, BATCH), 0, INPUT_SIZE, jnp.int32)
    hidden0 = jnp.zeros((1, BATCH, HIDDEN_SIZE), jnp.float32)

    fwd = jax.jit(lambda tok, hid: gct_forward(tok, hid, prepared))
    out, hid = fwd(tokens, hidden0)
    out, hid = jax.block_until_ready(out), jax.block_until_ready(hid)

    ref_out, ref_hid = gct_reference(tokens, hidden0, params)
    assert out.shape == (SEQ_LEN, BATCH, OUTPUT_SIZE)
    assert hid.shape == (1, BATCH, HIDDEN_SIZE)
    # bf16 MXU operands (f32 accumulate) vs f32 reference: loosened tolerance.
    assert jnp.allclose(out, ref_out, atol=2e-2, rtol=2e-2)
    assert jnp.allclose(hid, ref_hid, atol=2e-2, rtol=2e-2)

    print("KERNEL_OK")
</pallas_src>

<mosaic_0001>
module attributes {stable_mosaic.version = 11 : i64} {
  func.func @gct_kernel(%arg0: i32, %arg1: memref<64x32xbf16, #tpu.memory_space<vmem>>, %arg2: memref<8x128xf32, #tpu.memory_space<vmem>>, %arg3: memref<32x384xbf16, #tpu.memory_space<vmem>>, %arg4: memref<128x384xbf16, #tpu.memory_space<vmem>>, %arg5: memref<2x384xf32, #tpu.memory_space<vmem>>, %arg6: memref<128x128xbf16, #tpu.memory_space<vmem>>, %arg7: memref<1x128xf32, #tpu.memory_space<vmem>>, %arg8: memref<64x128xf32, #tpu.memory_space<vmem>>, %arg9: memref<8x128xf32, #tpu.memory_space<vmem>>) attributes {dimension_semantics = [#tpu.dimension_semantics<arbitrary>], iteration_bounds = array<i64: 1>, scalar_prefetch = 0 : i64, scratch_operands = 0 : i64, tpu.core_type = #tpu.core_type<tc>, window_params = [{pipeline_mode = #tpu.pipeline_mode<synchronous>, transform_indices = @transform_0, window_bounds = array<i64: 64, 32>}, {pipeline_mode = #tpu.pipeline_mode<synchronous>, transform_indices = @transform_1, window_bounds = array<i64: 8, 128>}, {pipeline_mode = #tpu.pipeline_mode<synchronous>, transform_indices = @transform_2, window_bounds = array<i64: 32, 384>}, {pipeline_mode = #tpu.pipeline_mode<synchronous>, transform_indices = @transform_3, window_bounds = array<i64: 128, 384>}, {pipeline_mode = #tpu.pipeline_mode<synchronous>, transform_indices = @transform_4, window_bounds = array<i64: 2, 384>}, {pipeline_mode = #tpu.pipeline_mode<synchronous>, transform_indices = @transform_5, window_bounds = array<i64: 128, 128>}, {pipeline_mode = #tpu.pipeline_mode<synchronous>, transform_indices = @transform_6, window_bounds = array<i64: 1, 128>}, {pipeline_mode = #tpu.pipeline_mode<synchronous>, transform_indices = @transform_7, window_bounds = array<i64: 64, 128>}, {pipeline_mode = #tpu.pipeline_mode<synchronous>, transform_indices = @transform_8, window_bounds = array<i64: 8, 128>}]} {
    %c0 = arith.constant 0 : index
    %c0_0 = arith.constant 0 : index
    %0 = vector.load %arg1[%c0, %c0_0] : memref<64x32xbf16, #tpu.memory_space<vmem>>, vector<64x32xbf16>
    %c0_1 = arith.constant 0 : index
    %c0_2 = arith.constant 0 : index
    %1 = vector.load %arg3[%c0_1, %c0_2] : memref<32x384xbf16, #tpu.memory_space<vmem>>, vector<32x384xbf16>
    %cst = arith.constant dense<0.000000e+00> : vector<64x384xf32>
    %2 = tpu.matmul %0, %1, %cst {dimension_numbers = #tpu.dot_dimension_numbers<[1], [0], [0], [1], [0, 0, 1, 1], [], []>} : vector<64x32xbf16>, vector<32x384xbf16>, vector<64x384xf32> -> vector<64x384xf32>
    %c0_3 = arith.constant 0 : index
    %c0_4 = arith.constant 0 : index
    %3 = vector.load %arg5[%c0_3, %c0_4] : memref<2x384xf32, #tpu.memory_space<vmem>>, vector<1x384xf32>
    %4 = vector.broadcast %3 : vector<1x384xf32> to vector<64x384xf32>
    %5 = arith.addf %2, %4 : vector<64x384xf32>
    %c1 = arith.constant 1 : index
    %c256 = arith.constant 256 : index
    %6 = vector.load %arg5[%c1, %c256] : memref<2x384xf32, #tpu.memory_space<vmem>>, vector<1x128xf32>
    %c0_5 = arith.constant 0 : index
    %c0_6 = arith.constant 0 : index
    %7 = vector.load %arg4[%c0_5, %c0_6] : memref<128x384xbf16, #tpu.memory_space<vmem>>, vector<128x384xbf16>
    %c0_7 = arith.constant 0 : index
    %c0_8 = arith.constant 0 : index
    %8 = vector.load %arg2[%c0_7, %c0_8] : memref<8x128xf32, #tpu.memory_space<vmem>>, vector<8x128xf32>
    %9 = arith.truncf %8 : vector<8x128xf32> to vector<8x128xbf16>
    %cst_9 = arith.constant dense<0.000000e+00> : vector<8x384xf32>
    %10 = tpu.matmul %9, %7, %cst_9 {dimension_numbers = #tpu.dot_dimension_numbers<[1], [0], [0], [1], [0, 0, 1, 1], [], []>} : vector<8x128xbf16>, vector<128x384xbf16>, vector<8x384xf32> -> vector<8x384xf32>
    %11 = vector.extract_strided_slice %5 {offsets = [0, 0], sizes = [8, 256], strides = [1, 1]} : vector<64x384xf32> to vector<8x256xf32>
    %12 = vector.extract_strided_slice %10 {offsets = [0, 0], sizes = [8, 256], strides = [1, 1]} : vector<8x384xf32> to vector<8x256xf32>
    %13 = arith.addf %11, %12 : vector<8x256xf32>
    %14 = arith.negf %13 : vector<8x256xf32>
    %15 = math.exp %14 : vector<8x256xf32>
    %cst_10 = arith.constant 1.000000e+00 : f32
    %16 = vector.broadcast %cst_10 : f32 to vector<8x256xf32>
    %17 = arith.addf %16, %15 : vector<8x256xf32>
    %18 = arith.divf %16, %17 : vector<8x256xf32>
    %19 = vector.extract_strided_slice %18 {offsets = [0, 0], sizes = [8, 128], strides = [1, 1]} : vector<8x256xf32> to vector<8x128xf32>
    %20 = vector.extract_strided_slice %18 {offsets = [0, 128], sizes = [8, 128], strides = [1, 1]} : vector<8x256xf32> to vector<8x128xf32>
    %21 = vector.extract_strided_slice %5 {offsets = [0, 256], sizes = [8, 128], strides = [1, 1]} : vector<64x384xf32> to vector<8x128xf32>
    %22 = vector.extract_strided_slice %10 {offsets = [0, 256], sizes = [8, 128], strides = [1, 1]} : vector<8x384xf32> to vector<8x128xf32>
    %23 = vector.broadcast %6 : vector<1x128xf32> to vector<8x128xf32>
    %24 = arith.addf %22, %23 : vector<8x128xf32>
    %25 = arith.mulf %19, %24 : vector<8x128xf32>
    %26 = arith.addf %21, %25 : vector<8x128xf32>
    %27 = math.tanh %26 : vector<8x128xf32>
    %cst_11 = arith.constant 1.000000e+00 : f32
    %28 = vector.broadcast %cst_11 : f32 to vector<8x128xf32>
    %29 = arith.subf %28, %20 : vector<8x128xf32>
    %30 = arith.mulf %29, %27 : vector<8x128xf32>
    %31 = arith.mulf %20, %8 : vector<8x128xf32>
    %32 = arith.addf %30, %31 : vector<8x128xf32>
    %33 = arith.truncf %32 : vector<8x128xf32> to vector<8x128xbf16>
    %cst_12 = arith.constant dense<0.000000e+00> : vector<8x384xf32>
    %34 = tpu.matmul %33, %7, %cst_12 {dimension_numbers = #tpu.dot_dimension_numbers<[1], [0], [0], [1], [0, 0, 1, 1], [], []>} : vector<8x128xbf16>, vector<128x384xbf16>, vector<8x384xf32> -> vector<8x384xf32>
    %35 = vector.extract_strided_slice %5 {offsets = [8, 0], sizes = [8, 256], strides = [1, 1]} : vector<64x384xf32> to vector<8x256xf32>
    %36 = vector.extract_strided_slice %34 {offsets = [0, 0], sizes = [8, 256], strides = [1, 1]} : vector<8x384xf32> to vector<8x256xf32>
    %37 = arith.addf %35, %36 : vector<8x256xf32>
    %38 = arith.negf %37 : vector<8x256xf32>
    %39 = math.exp %38 : vector<8x256xf32>
    %cst_13 = arith.constant 1.000000e+00 : f32
    %40 = vector.broadcast %cst_13 : f32 to vector<8x256xf32>
    %41 = arith.addf %40, %39 : vector<8x256xf32>
    %42 = arith.divf %40, %41 : vector<8x256xf32>
    %43 = vector.extract_strided_slice %42 {offsets = [0, 0], sizes = [8, 128], strides = [1, 1]} : vector<8x256xf32> to vector<8x128xf32>
    %44 = vector.extract_strided_slice %42 {offsets = [0, 128], sizes = [8, 128], strides = [1, 1]} : vector<8x256xf32> to vector<8x128xf32>
    %45 = vector.extract_strided_slice %5 {offsets = [8, 256], sizes = [8, 128], strides = [1, 1]} : vector<64x384xf32> to vector<8x128xf32>
    %46 = vector.extract_strided_slice %34 {offsets = [0, 256], sizes = [8, 128], strides = [1, 1]} : vector<8x384xf32> to vector<8x128xf32>
    %47 = vector.broadcast %6 : vector<1x128xf32> to vector<8x128xf32>
    %48 = arith.addf %46, %47 : vector<8x128xf32>
    %49 = arith.mulf %43, %48 : vector<8x128xf32>
    %50 = arith.addf %45, %49 : vector<8x128xf32>
    %51 = math.tanh %50 : vector<8x128xf32>
    %cst_14 = arith.constant 1.000000e+00 : f32
    %52 = vector.broadcast %cst_14 : f32 to vector<8x128xf32>
    %53 = arith.subf %52, %44 : vector<8x128xf32>
    %54 = arith.mulf %53, %51 : vector<8x128xf32>
    %55 = arith.mulf %44, %32 : vector<8x128xf32>
    %56 = arith.addf %54, %55 : vector<8x128xf32>
    %57 = arith.truncf %56 : vector<8x128xf32> to vector<8x128xbf16>
    %cst_15 = arith.constant dense<0.000000e+00> : vector<8x384xf32>
    %58 = tpu.matmul %57, %7, %cst_15 {dimension_numbers = #tpu.dot_dimension_numbers<[1], [0], [0], [1], [0, 0, 1, 1], [], []>} : vector<8x128xbf16>, vector<128x384xbf16>, vector<8x384xf32> -> vector<8x384xf32>
    %59 = vector.extract_strided_slice %5 {offsets = [16, 0], sizes = [8, 256], strides = [1, 1]} : vector<64x384xf32> to vector<8x256xf32>
    %60 = vector.extract_strided_slice %58 {offsets = [0, 0], sizes = [8, 256], strides = [1, 1]} : vector<8x384xf32> to vector<8x256xf32>
    %61 = arith.addf %59, %60 : vector<8x256xf32>
    %62 = arith.negf %61 : vector<8x256xf32>
    %63 = math.exp %62 : vector<8x256xf32>
    %cst_16 = arith.constant 1.000000e+00 : f32
    %64 = vector.broadcast %cst_16 : f32 to vector<8x256xf32>
    %65 = arith.addf %64, %63 : vector<8x256xf32>
    %66 = arith.divf %64, %65 : vector<8x256xf32>
    %67 = vector.extract_strided_slice %66 {offsets = [0, 0], sizes = [8, 128], strides = [1, 1]} : vector<8x256xf32> to vector<8x128xf32>
    %68 = vector.extract_strided_slice %66 {offsets = [0, 128], sizes = [8, 128], strides = [1, 1]} : vector<8x256xf32> to vector<8x128xf32>
    %69 = vector.extract_strided_slice %5 {offsets = [16, 256], sizes = [8, 128], strides = [1, 1]} : vector<64x384xf32> to vector<8x128xf32>
    %70 = vector.extract_strided_slice %58 {offsets = [0, 256], sizes = [8, 128], strides = [1, 1]} : vector<8x384xf32> to vector<8x128xf32>
    %71 = vector.broadcast %6 : vector<1x128xf32> to vector<8x128xf32>
    %72 = arith.addf %70, %71 : vector<8x128xf32>
    %73 = arith.mulf %67, %72 : vector<8x128xf32>
    %74 = arith.addf %69, %73 : vector<8x128xf32>
    %75 = math.tanh %74 : vector<8x128xf32>
    %cst_17 = arith.constant 1.000000e+00 : f32
    %76 = vector.broadcast %cst_17 : f32 to vector<8x128xf32>
    %77 = arith.subf %76, %68 : vector<8x128xf32>
    %78 = arith.mulf %77, %75 : vector<8x128xf32>
    %79 = arith.mulf %68, %56 : vector<8x128xf32>
    %80 = arith.addf %78, %79 : vector<8x128xf32>
    %81 = arith.truncf %80 : vector<8x128xf32> to vector<8x128xbf16>
    %cst_18 = arith.constant dense<0.000000e+00> : vector<8x384xf32>
    %82 = tpu.matmul %81, %7, %cst_18 {dimension_numbers = #tpu.dot_dimension_numbers<[1], [0], [0], [1], [0, 0, 1, 1], [], []>} : vector<8x128xbf16>, vector<128x384xbf16>, vector<8x384xf32> -> vector<8x384xf32>
    %83 = vector.extract_strided_slice %5 {offsets = [24, 0], sizes = [8, 256], strides = [1, 1]} : vector<64x384xf32> to vector<8x256xf32>
    %84 = vector.extract_strided_slice %82 {offsets = [0, 0], sizes = [8, 256], strides = [1, 1]} : vector<8x384xf32> to vector<8x256xf32>
    %85 = arith.addf %83, %84 : vector<8x256xf32>
    %86 = arith.negf %85 : vector<8x256xf32>
    %87 = math.exp %86 : vector<8x256xf32>
    %cst_19 = arith.constant 1.000000e+00 : f32
    %88 = vector.broadcast %cst_19 : f32 to vector<8x256xf32>
    %89 = arith.addf %88, %87 : vector<8x256xf32>
    %90 = arith.divf %88, %89 : vector<8x256xf32>
    %91 = vector.extract_strided_slice %90 {offsets = [0, 0], sizes = [8, 128], strides = [1, 1]} : vector<8x256xf32> to vector<8x128xf32>
    %92 = vector.extract_strided_slice %90 {offsets = [0, 128], sizes = [8, 128], strides = [1, 1]} : vector<8x256xf32> to vector<8x128xf32>
    %93 = vector.extract_strided_slice %5 {offsets = [24, 256], sizes = [8, 128], strides = [1, 1]} : vector<64x384xf32> to vector<8x128xf32>
    %94 = vector.extract_strided_slice %82 {offsets = [0, 256], sizes = [8, 128], strides = [1, 1]} : vector<8x384xf32> to vector<8x128xf32>
    %95 = vector.broadcast %6 : vector<1x128xf32> to vector<8x128xf32>
    %96 = arith.addf %94, %95 : vector<8x128xf32>
    %97 = arith.mulf %91, %96 : vector<8x128xf32>
    %98 = arith.addf %93, %97 : vector<8x128xf32>
    %99 = math.tanh %98 : vector<8x128xf32>
    %cst_20 = arith.constant 1.000000e+00 : f32
    %100 = vector.broadcast %cst_20 : f32 to vector<8x128xf32>
    %101 = arith.subf %100, %92 : vector<8x128xf32>
    %102 = arith.mulf %101, %99 : vector<8x128xf32>
    %103 = arith.mulf %92, %80 : vector<8x128xf32>
    %104 = arith.addf %102, %103 : vector<8x128xf32>
    %105 = arith.truncf %104 : vector<8x128xf32> to vector<8x128xbf16>
    %cst_21 = arith.constant dense<0.000000e+00> : vector<8x384xf32>
    %106 = tpu.matmul %105, %7, %cst_21 {dimension_numbers = #tpu.dot_dimension_numbers<[1], [0], [0], [1], [0, 0, 1, 1], [], []>} : vector<8x128xbf16>, vector<128x384xbf16>, vector<8x384xf32> -> vector<8x384xf32>
    %107 = vector.extract_strided_slice %5 {offsets = [32, 0], sizes = [8, 256], strides = [1, 1]} : vector<64x384xf32> to vector<8x256xf32>
    %108 = vector.extract_strided_slice %106 {offsets = [0, 0], sizes = [8, 256], strides = [1, 1]} : vector<8x384xf32> to vector<8x256xf32>
    %109 = arith.addf %107, %108 : vector<8x256xf32>
    %110 = arith.negf %109 : vector<8x256xf32>
    %111 = math.exp %110 : vector<8x256xf32>
    %cst_22 = arith.constant 1.000000e+00 : f32
    %112 = vector.broadcast %cst_22 : f32 to vector<8x256xf32>
    %113 = arith.addf %112, %111 : vector<8x256xf32>
    %114 = arith.divf %112, %113 : vector<8x256xf32>
    %115 = vector.extract_strided_slice %114 {offsets = [0, 0], sizes = [8, 128], strides = [1, 1]} : vector<8x256xf32> to vector<8x128xf32>
    %116 = vector.extract_strided_slice %114 {offsets = [0, 128], sizes = [8, 128], strides = [1, 1]} : vector<8x256xf32> to vector<8x128xf32>
    %117 = vector.extract_strided_slice %5 {offsets = [32, 256], sizes = [8, 128], strides = [1, 1]} : vector<64x384xf32> to vector<8x128xf32>
    %118 = vector.extract_strided_slice %106 {offsets = [0, 256], sizes = [8, 128], strides = [1, 1]} : vector<8x384xf32> to vector<8x128xf32>
    %119 = vector.broadcast %6 : vector<1x128xf32> to vector<8x128xf32>
    %120 = arith.addf %118, %119 : vector<8x128xf32>
    %121 = arith.mulf %115, %120 : vector<8x128xf32>
    %122 = arith.addf %117, %121 : vector<8x128xf32>
    %123 = math.tanh %122 : vector<8x128xf32>
    %cst_23 = arith.constant 1.000000e+00 : f32
    %124 = vector.broadcast %cst_23 : f32 to vector<8x128xf32>
    %125 = arith.subf %124, %116 : vector<8x128xf32>
    %126 = arith.mulf %125, %123 : vector<8x128xf32>
    %127 = arith.mulf %116, %104 : vector<8x128xf32>
    %128 = arith.addf %126, %127 : vector<8x128xf32>
    %129 = arith.truncf %128 : vector<8x128xf32> to vector<8x128xbf16>
    %cst_24 = arith.constant dense<0.000000e+00> : vector<8x384xf32>
    %130 = tpu.matmul %129, %7, %cst_24 {dimension_numbers = #tpu.dot_dimension_numbers<[1], [0], [0], [1], [0, 0, 1, 1], [], []>} : vector<8x128xbf16>, vector<128x384xbf16>, vector<8x384xf32> -> vector<8x384xf32>
    %131 = vector.extract_strided_slice %5 {offsets = [40, 0], sizes = [8, 256], strides = [1, 1]} : vector<64x384xf32> to vector<8x256xf32>
    %132 = vector.extract_strided_slice %130 {offsets = [0, 0], sizes = [8, 256], strides = [1, 1]} : vector<8x384xf32> to vector<8x256xf32>
    %133 = arith.addf %131, %132 : vector<8x256xf32>
    %134 = arith.negf %133 : vector<8x256xf32>
    %135 = math.exp %134 : vector<8x256xf32>
    %cst_25 = arith.constant 1.000000e+00 : f32
    %136 = vector.broadcast %cst_25 : f32 to vector<8x256xf32>
    %137 = arith.addf %136, %135 : vector<8x256xf32>
    %138 = arith.divf %136, %137 : vector<8x256xf32>
    %139 = vector.extract_strided_slice %138 {offsets = [0, 0], sizes = [8, 128], strides = [1, 1]} : vector<8x256xf32> to vector<8x128xf32>
    %140 = vector.extract_strided_slice %138 {offsets = [0, 128], sizes = [8, 128], strides = [1, 1]} : vector<8x256xf32> to vector<8x128xf32>
    %141 = vector.extract_strided_slice %5 {offsets = [40, 256], sizes = [8, 128], strides = [1, 1]} : vector<64x384xf32> to vector<8x128xf32>
    %142 = vector.extract_strided_slice %130 {offsets = [0, 256], sizes = [8, 128], strides = [1, 1]} : vector<8x384xf32> to vector<8x128xf32>
    %143 = vector.broadcast %6 : vector<1x128xf32> to vector<8x128xf32>
    %144 = arith.addf %142, %143 : vector<8x128xf32>
    %145 = arith.mulf %139, %144 : vector<8x128xf32>
    %146 = arith.addf %141, %145 : vector<8x128xf32>
    %147 = math.tanh %146 : vector<8x128xf32>
    %cst_26 = arith.constant 1.000000e+00 : f32
    %148 = vector.broadcast %cst_26 : f32 to vector<8x128xf32>
    %149 = arith.subf %148, %140 : vector<8x128xf32>
    %150 = arith.mulf %149, %147 : vector<8x128xf32>
    %151 = arith.mulf %140, %128 : vector<8x128xf32>
    %152 = arith.addf %150, %151 : vector<8x128xf32>
    %153 = arith.truncf %152 : vector<8x128xf32> to vector<8x128xbf16>
    %cst_27 = arith.constant dense<0.000000e+00> : vector<8x384xf32>
    %154 = tpu.matmul %153, %7, %cst_27 {dimension_numbers = #tpu.dot_dimension_numbers<[1], [0], [0], [1], [0, 0, 1, 1], [], []>} : vector<8x128xbf16>, vector<128x384xbf16>, vector<8x384xf32> -> vector<8x384xf32>
    %155 = vector.extract_strided_slice %5 {offsets = [48, 0], sizes = [8, 256], strides = [1, 1]} : vector<64x384xf32> to vector<8x256xf32>
    %156 = vector.extract_strided_slice %154 {offsets = [0, 0], sizes = [8, 256], strides = [1, 1]} : vector<8x384xf32> to vector<8x256xf32>
    %157 = arith.addf %155, %156 : vector<8x256xf32>
    %158 = arith.negf %157 : vector<8x256xf32>
    %159 = math.exp %158 : vector<8x256xf32>
    %cst_28 = arith.constant 1.000000e+00 : f32
    %160 = vector.broadcast %cst_28 : f32 to vector<8x256xf32>
    %161 = arith.addf %160, %159 : vector<8x256xf32>
    %162 = arith.divf %160, %161 : vector<8x256xf32>
    %163 = vector.extract_strided_slice %162 {offsets = [0, 0], sizes = [8, 128], strides = [1, 1]} : vector<8x256xf32> to vector<8x128xf32>
    %164 = vector.extract_strided_slice %162 {offsets = [0, 128], sizes = [8, 128], strides = [1, 1]} : vector<8x256xf32> to vector<8x128xf32>
    %165 = vector.extract_strided_slice %5 {offsets = [48, 256], sizes = [8, 128], strides = [1, 1]} : vector<64x384xf32> to vector<8x128xf32>
    %166 = vector.extract_strided_slice %154 {offsets = [0, 256], sizes = [8, 128], strides = [1, 1]} : vector<8x384xf32> to vector<8x128xf32>
    %167 = vector.broadcast %6 : vector<1x128xf32> to vector<8x128xf32>
    %168 = arith.addf %166, %167 : vector<8x128xf32>
    %169 = arith.mulf %163, %168 : vector<8x128xf32>
    %170 = arith.addf %165, %169 : vector<8x128xf32>
    %171 = math.tanh %170 : vector<8x128xf32>
    %cst_29 = arith.constant 1.000000e+00 : f32
    %172 = vector.broadcast %cst_29 : f32 to vector<8x128xf32>
    %173 = arith.subf %172, %164 : vector<8x128xf32>
    %174 = arith.mulf %173, %171 : vector<8x128xf32>
    %175 = arith.mulf %164, %152 : vector<8x128xf32>
    %176 = arith.addf %174, %175 : vector<8x128xf32>
    %177 = arith.truncf %176 : vector<8x128xf32> to vector<8x128xbf16>
    %cst_30 = arith.constant dense<0.000000e+00> : vector<8x384xf32>
    %178 = tpu.matmul %177, %7, %cst_30 {dimension_numbers = #tpu.dot_dimension_numbers<[1], [0], [0], [1], [0, 0, 1, 1], [], []>} : vector<8x128xbf16>, vector<128x384xbf16>, vector<8x384xf32> -> vector<8x384xf32>
    %179 = vector.extract_strided_slice %5 {offsets = [56, 0], sizes = [8, 256], strides = [1, 1]} : vector<64x384xf32> to vector<8x256xf32>
    %180 = vector.extract_strided_slice %178 {offsets = [0, 0], sizes = [8, 256], strides = [1, 1]} : vector<8x384xf32> to vector<8x256xf32>
    %181 = arith.addf %179, %180 : vector<8x256xf32>
    %182 = arith.negf %181 : vector<8x256xf32>
    %183 = math.exp %182 : vector<8x256xf32>
    %cst_31 = arith.constant 1.000000e+00 : f32
    %184 = vector.broadcast %cst_31 : f32 to vector<8x256xf32>
    %185 = arith.addf %184, %183 : vector<8x256xf32>
    %186 = arith.divf %184, %185 : vector<8x256xf32>
    %187 = vector.extract_strided_slice %186 {offsets = [0, 0], sizes = [8, 128], strides = [1, 1]} : vector<8x256xf32> to vector<8x128xf32>
    %188 = vector.extract_strided_slice %186 {offsets = [0, 128], sizes = [8, 128], strides = [1, 1]} : vector<8x256xf32> to vector<8x128xf32>
    %189 = vector.extract_strided_slice %5 {offsets = [56, 256], sizes = [8, 128], strides = [1, 1]} : vector<64x384xf32> to vector<8x128xf32>
    %190 = vector.extract_strided_slice %178 {offsets = [0, 256], sizes = [8, 128], strides = [1, 1]} : vector<8x384xf32> to vector<8x128xf32>
    %191 = vector.broadcast %6 : vector<1x128xf32> to vector<8x128xf32>
    %192 = arith.addf %190, %191 : vector<8x128xf32>
    %193 = arith.mulf %187, %192 : vector<8x128xf32>
    %194 = arith.addf %189, %193 : vector<8x128xf32>
    %195 = math.tanh %194 : vector<8x128xf32>
    %cst_32 = arith.constant 1.000000e+00 : f32
    %196 = vector.broadcast %cst_32 : f32 to vector<8x128xf32>
    %197 = arith.subf %196, %188 : vector<8x128xf32>
    %198 = arith.mulf %197, %195 : vector<8x128xf32>
    %199 = arith.mulf %188, %176 : vector<8x128xf32>
    %200 = arith.addf %198, %199 : vector<8x128xf32>
    %c0_33 = arith.constant 0 : index
    %c0_34 = arith.constant 0 : index
    %201 = vector.load %arg9[%c0_33, %c0_34] : memref<8x128xf32, #tpu.memory_space<vmem>>, vector<8x128xf32>
    tpu.vector_store %arg9[%c0_33, %c0_34], %200 {strides = array<i32>} : memref<8x128xf32, #tpu.memory_space<vmem>>, vector<8x128xf32>,
    %202 = tpu.concatenate %32, %56, %80, %104, %128, %152, %176, %200 in 0 : vector<8x128xf32>, vector<8x128xf32>, vector<8x128xf32>, vector<8x128xf32>, vector<8x128xf32>, vector<8x128xf32>, vector<8x128xf32>, vector<8x128xf32> -> vector<64x128xf32>
    %203 = arith.truncf %202 : vector<64x128xf32> to vector<64x128xbf16>
    %c0_35 = arith.constant 0 : index
    %c0_36 = arith.constant 0 : index
    %204 = vector.load %arg6[%c0_35, %c0_36] : memref<128x128xbf16, #tpu.memory_space<vmem>>, vector<128x128xbf16>
    %cst_37 = arith.constant dense<0.000000e+00> : vector<64x128xf32>
    %205 = tpu.matmul %203, %204, %cst_37 {dimension_numbers = #tpu.dot_dimension_numbers<[1], [0], [0], [1], [0, 0, 1, 1], [], []>} : vector<64x128xbf16>, vector<128x128xbf16>, vector<64x128xf32> -> vector<64x128xf32>
    %c0_38 = arith.constant 0 : index
    %c0_39 = arith.constant 0 : index
    %206 = vector.load %arg7[%c0_38, %c0_39] : memref<1x128xf32, #tpu.memory_space<vmem>>, vector<1x128xf32>
    %207 = vector.broadcast %206 : vector<1x128xf32> to vector<64x128xf32>
    %208 = arith.addf %205, %207 : vector<64x128xf32>
    %c0_40 = arith.constant 0 : index
    %c0_41 = arith.constant 0 : index
    %209 = vector.load %arg8[%c0_40, %c0_41] : memref<64x128xf32, #tpu.memory_space<vmem>>, vector<64x128xf32>
    tpu.vector_store %arg8[%c0_40, %c0_41], %208 {strides = array<i32>} : memref<64x128xf32, #tpu.memory_space<vmem>>, vector<64x128xf32>,
    return
  }
  func.func @transform_0(%arg0: i32) -> (i32, i32) {
    %c0_i32 = arith.constant 0 : i32
    %c0_i32_0 = arith.constant 0 : i32
    %c0_i32_1 = arith.constant 0 : i32
    return %c0_i32, %c0_i32_0 : i32, i32
  }
  func.func @transform_1(%arg0: i32) -> (i32, i32) {
    %c0_i32 = arith.constant 0 : i32
    %c0_i32_0 = arith.constant 0 : i32
    %c0_i32_1 = arith.constant 0 : i32
    return %c0_i32, %c0_i32_0 : i32, i32
  }
  func.func @transform_2(%arg0: i32) -> (i32, i32) {
    %c0_i32 = arith.constant 0 : i32
    %c0_i32_0 = arith.constant 0 : i32
    %c0_i32_1 = arith.constant 0 : i32
    return %c0_i32, %c0_i32_0 : i32, i32
  }
  func.func @transform_3(%arg0: i32) -> (i32, i32) {
    %c0_i32 = arith.constant 0 : i32
    %c0_i32_0 = arith.constant 0 : i32
    %c0_i32_1 = arith.constant 0 : i32
    return %c0_i32, %c0_i32_0 : i32, i32
  }
  func.func @transform_4(%arg0: i32) -> (i32, i32) {
    %c0_i32 = arith.constant 0 : i32
    %c0_i32_0 = arith.constant 0 : i32
    %c0_i32_1 = arith.constant 0 : i32
    return %c0_i32, %c0_i32_0 : i32, i32
  }
  func.func @transform_5(%arg0: i32) -> (i32, i32) {
    %c0_i32 = arith.constant 0 : i32
    %c0_i32_0 = arith.constant 0 : i32
    %c0_i32_1 = arith.constant 0 : i32
    return %c0_i32, %c0_i32_0 : i32, i32
  }
  func.func @transform_6(%arg0: i32) -> (i32, i32) {
    %c0_i32 = arith.constant 0 : i32
    %c0_i32_0 = arith.constant 0 : i32
    %c0_i32_1 = arith.constant 0 : i32
    return %c0_i32, %c0_i32_0 : i32, i32
  }
  func.func @transform_7(%arg0: i32) -> (i32, i32) {
    %c0_i32 = arith.constant 0 : i32
    %c0_i32_0 = arith.constant 0 : i32
    %c0_i32_1 = arith.constant 0 : i32
    return %c0_i32, %c0_i32_0 : i32, i32
  }
  func.func @transform_8(%arg0: i32) -> (i32, i32) {
    %c0_i32 = arith.constant 0 : i32
    %c0_i32_0 = arith.constant 0 : i32
    %c0_i32_1 = arith.constant 0 : i32
    return %c0_i32, %c0_i32_0 : i32, i32
  }
}

</mosaic_0001>

<bundles_post_ra>
// kernel: _lambda_.1
= control target key start
LH: loop header
LB: loop body
LE: loop exit
PB: predicated region body
PF: predicated region fallthrough
CT: control target
= control target key end

     0   :  { %14 = vsyncpa [#allocation3], 0  ;;  %s1559_s30 = smov [#allocation2]   ;;  %s1560_s10 = smov 192   ;;  %s2250_s0 = inlined_call_operand.vmem [shape: bf16[64,32], index: 0, kind: input, shape index: {}]   ;;  %s2251_s1 = inlined_call_operand.vmem [shape: f32[8,128], index: 1, kind: input, shape index: {}]   ;;  %s2252_s2 = inlined_call_operand.hbm [shape: bf16[32,384], index: 2, kind: input, shape index: {}]   ;;  %s2253_s3 = inlined_call_operand.vmem [shape: bf16[128,384], index: 3, kind: input, shape index: {}]   ;;  %s2254_s4 = inlined_call_operand.vmem [shape: f32[2,384], index: 4, kind: input, shape index: {}]   ;;  %s2255_s5 = inlined_call_operand.vmem [shape: bf16[128,128], index: 5, kind: input, shape index: {}]   ;;  %s2256_s6 = inlined_call_operand.vmem [shape: f32[1,128], index: 6, kind: input, shape index: {}]   ;;  %s2257_s7 = inlined_call_operand.vmem [shape: f32[64,128], index: 7, kind: output, shape index: {0}]   ;;  %s2258_s8 = inlined_call_operand.vmem [shape: f32[8,128], index: 8, kind: output, shape index: {1}]  }
   0x1   :  { %s23_s29 = sshll.u32 %s2252_s2, 4  ;;  %s25_s9 = sshll.u32 %s1559_s30, 4  ;;  %s24_s29 = int_to_ptr.hbm [resolvable:$true] %s23_s29  ;;  %s26_s9 = int_to_ptr.vmem [resolvable:$true] %s25_s9 }
   0x2   :  { %s1561_s11 = smov 12  }
   0x3   :  { %31 = dma.hbm_to_vmem [thread:$0]  %s24_s29, 768, %s26_s9, [#allocation3], %s1560_s10, %s1560_s10, %s1561_s11  }
   0x4   :  { %1557 = dma.done.wait [#allocation3], 768  }
   0x5   :  { %1558 = vsyncadd [#allocation3], 4294966528  ;;  %v1245_v0 = vld [vmem:[#allocation2 + $0x20] sm:$0xf]  ;;  %v1412_v1 = vld [vmem:[#allocation2 + $0x28] sm:$0xf0] }
   0x6   :  { %v1237_v2 = vld [vmem:[#allocation2 + $0x18] sm:$0xf]  ;;  %v1246_v3 = vor.u32 %v1412_v1, %v1245_v0  ;;  %v1411_v4 = vld [vmem:[#allocation2 + $0x20] sm:$0xf0]  ;;  %v1233_v5 = vld [vmem:[#allocation2 + $0x8] sm:$0xf] }
   0x7   :  { %v1409_v6 = vld [vmem:[#allocation2 + $0x10] sm:$0xf0]  ;;  %v1238_v7 = vor.u32 %v1411_v4, %v1237_v2  ;;  %v1345_v8 = vld [vmem:[%s2253_s3 + $0xa8] sm:$0xf]  ;;  %v1225_v10 = vld [vmem:[#allocation2] sm:$0xf] }
   0x8   :  { %v1435_v9 = vld [vmem:[%s2253_s3 + $0xb0] sm:$0xf0]  ;;  %1445 = vmatpush.bf16.msra.mxu3 %v1246_v3  ;;  %v1234_v11 = vor.u32 %v1409_v6, %v1233_v5  ;;  %v1408_v12 = vld [vmem:[#allocation2 + $0x8] sm:$0xf0]  ;;  %198 = vmatpush.bf16.msra.mxu2 %v1246_v3  ;;  %v1333_v15 = vld [vmem:[%s2253_s3 + $0x90] sm:$0xf] }
   0x9   :  { %140 = vmatpush.bf16.msra.mxu0 %v1238_v7  ;;  %v1616_v13 = vor.u32 %v1435_v9, %v1345_v8  ;;  %v1226_v14 = vor.u32 %v1408_v12, %v1225_v10  ;;  %v1432_v16 = vld [vmem:[%s2253_s3 + $0x98] sm:$0xf0]  ;;  %v1627_v17 = vld [vmem:[%s2250_s0 + $0x10] sm:$0xff]  ;;  %vm121_vm0 = vcmask 261120   ;;  %v1632_v18 = vld [vmem:[%s2250_s0] sm:$0xff] }
   0xa   :  { %v1635_v19 = vor.u32 %v1432_v16, %v1333_v15  ;;  %v1353_v20 = vld [vmem:[%s2253_s3 + $0xb0] sm:$0xf]  ;;  %v1436_v21 = vld [vmem:[%s2253_s3 + $0xb8] sm:$0xf0]  ;;  %v1321_v22 = vld [vmem:[%s2253_s3 + $0x78] sm:$0xf] }
   0xb   :  { %v1429_v23 = vld [vmem:[%s2253_s3 + $0x80] sm:$0xf0]  ;;  %v1649_v24 = vor.u32 %v1436_v21, %v1353_v20  ;;  %v1434_v25 = vld [vmem:[%s2253_s3 + $0xac] sm:$0xf]  ;;  %v1347_v26 = vld [vmem:[%s2253_s3 + $0xb4] sm:$0xf0] }
   0xc   :  { %1446 = vmatpush.bf16.msra.mxu3 %v1234_v11  ;;  %199 = vmatpush.bf16.msra.mxu2 %v1234_v11  ;;  %v1341_v27 = vld [vmem:[%s2253_s3 + $0x98] sm:$0xf]  ;;  %v1666_v28 = vor.u32 %v1434_v25, %v1347_v26  ;;  %v1433_v29 = vld [vmem:[%s2253_s3 + $0xa0] sm:$0xf0]  ;;  %v1672_v30 = vor.u32 %v1429_v23, %v1321_v22  ;;  %v1309_v31 = vld [vmem:[%s2253_s3 + $0x60] sm:$0xf] }
   0xd   :  { %141 = vmatpush.bf16.msra.mxu0 %v1226_v14  ;;  %v1678_v32 = vor.u32 %v1433_v29, %v1341_v27  ;;  %v1431_v33 = vld [vmem:[%s2253_s3 + $0x94] sm:$0xf]  ;;  %v1335_v34 = vld [vmem:[%s2253_s3 + $0x9c] sm:$0xf0]  ;;  %v1426_v35 = vld [vmem:[%s2253_s3 + $0x68] sm:$0xf0] }
   0xe   :  { %v1329_v36 = vld [vmem:[%s2253_s3 + $0x80] sm:$0xf]  ;;  %v1430_v37 = vld [vmem:[%s2253_s3 + $0x88] sm:$0xf0]  ;;  %v1696_v38 = vor.u32 %v1431_v33, %v1335_v34  ;;  %v1699_v39 = vor.u32 %v1426_v35, %v1309_v31  ;;  %v1428_v40 = vld [vmem:[%s2253_s3 + $0x7c] sm:$0xf] }
   0xf   :  { %1257 = vmatmul.msk.bf16.vlgmr.msra.gmra.mxu3 %vm121_vm0, %v1627_v17  ;;  %1255 = vmatmul.msk.bf16.vlgmr.msra.gmra.mxu2 %vm121_vm0, %v1632_v18  ;;  %v1323_v41 = vld [vmem:[%s2253_s3 + $0x84] sm:$0xf0]  ;;  %v1708_v42 = vor.u32 %v1430_v37, %v1329_v36  ;;  %v1423_v44 = vld [vmem:[%s2253_s3 + $0x50] sm:$0xf0]  ;;  %v1285_v45 = vld [vmem:[%s2253_s3 + $0x30] sm:$0xf] }
  0x10   :  { %384 = vmatpush.bf16.msrb.mxu3 %v1616_v13  ;;  %1247 = vmatmul.msk.bf16.vlgmr.msra.gmra.mxu0 %vm121_vm0, %v1632_v18  ;;  %v1297_v43 = vld [vmem:[%s2253_s3 + $0x48] sm:$0xf]  ;;  %v1720_v46 = vor.u32 %v1428_v40, %v1323_v41  ;;  %v1420_v48 = vld [vmem:[%s2253_s3 + $0x38] sm:$0xf0]  ;;  %v1425_v49 = vld [vmem:[%s2253_s3 + $0x64] sm:$0xf] }
  0x11   :  { %410 = vmatpush.bf16.msrb.mxu0 %v1649_v24  ;;  %486 = vmatpush.bf16.msrb.mxu2 %v1666_v28  ;;  %v1723_v47 = vor.u32 %v1423_v44, %v1297_v43  ;;  %v1311_v50 = vld [vmem:[%s2253_s3 + $0x6c] sm:$0xf0]  ;;  %v1317_v51 = vld [vmem:[%s2253_s3 + $0x68] sm:$0xf]  ;;  %v1427_v52 = vld [vmem:[%s2253_s3 + $0x70] sm:$0xf0]  ;;  %v1757_v60 = vor.u32 %v1420_v48, %v1285_v45 }
  0x12   :  { %v1410_v53 = vld [vmem:[#allocation2 + $0x1c] sm:$0xf]  ;;  %v1747_v55 = vor.u32 %v1427_v52, %v1317_v51  ;;  %v1239_v56 = vld [vmem:[#allocation2 + $0x24] sm:$0xf0]  ;;  %v1754_v58 = vor.u32 %v1425_v49, %v1311_v50  ;;  %v1422_v61 = vld [vmem:[%s2253_s3 + $0x4c] sm:$0xf] }
  0x13   :  { %v1745_v54 = vld [vmem:[%s2250_s0 + $0x18] sm:$0xff]  ;;  %v1752_v57 = vld [vmem:[%s2250_s0 + $0x8] sm:$0xff]  ;;  %v1242_v59 = vor.u32 %v1410_v53, %v1239_v56  ;;  %v1417_v0 = vld [vmem:[%s2253_s3 + $0x20] sm:$0xf0] }
  0x14   :  { %385 = vmatpush.bf16.msrb.mxu3 %v1635_v19  ;;  %v1299_v62 = vld [vmem:[%s2253_s3 + $0x54] sm:$0xf0]  ;;  %v1407_v1 = vld [vmem:[#allocation2 + $0x4] sm:$0xf]  ;;  %v1227_v2 = vld [vmem:[#allocation2 + $0xc] sm:$0xf0] }
  0x15   :  { %411 = vmatpush.bf16.msrb.mxu0 %v1678_v32  ;;  %487 = vmatpush.bf16.msrb.mxu2 %v1696_v38  ;;  %v1273_v63 = vld [vmem:[%s2253_s3 + $0x18] sm:$0xf]  ;;  %v1779_v3 = vor.u32 %v1422_v61, %v1299_v62  ;;  %v1230_v4 = vor.u32 %v1407_v1, %v1227_v2  ;;  %v1305_v5 = vld [vmem:[%s2253_s3 + $0x50] sm:$0xf]  ;;  %v1424_v6 = vld [vmem:[%s2253_s3 + $0x58] sm:$0xf0] }
  0x16   :  { %169 = vmatpush.bf16.msra.mxu1 %v1242_v59  ;;  %v1788_v7 = vor.u32 %v1417_v0, %v1273_v63  ;;  %v1419_v8 = vld [vmem:[%s2253_s3 + $0x34] sm:$0xf]  ;;  %v1287_v9 = vld [vmem:[%s2253_s3 + $0x3c] sm:$0xf0]  ;;  %v1796_v10 = vor.u32 %v1424_v6, %v1305_v5  ;;  %v1414_v12 = vld [vmem:[%s2253_s3 + $0x8] sm:$0xf0] }
  0x17   :  { %v1261_v11 = vld [vmem:[%s2253_s3] sm:$0xf]  ;;  %v1293_v14 = vld [vmem:[%s2253_s3 + $0x38] sm:$0xf]  ;;  %v1421_v15 = vld [vmem:[%s2253_s3 + $0x40] sm:$0xf0]  ;;  %v1813_v16 = vor.u32 %v1419_v8, %v1287_v9 }
  0x18   :  { %386 = vmatpush.bf16.msrb.mxu3 %v1672_v30  ;;  %v1815_v20 = vor.u32 %v1421_v15, %v1293_v14  ;;  %v1818_v21 = vor.u32 %v1414_v12, %v1261_v11  ;;  %v1416_v22 = vld [vmem:[%s2253_s3 + $0x1c] sm:$0xf]  ;;  %v1275_v23 = vld [vmem:[%s2253_s3 + $0x24] sm:$0xf0]  ;;  %v1281_v25 = vld [vmem:[%s2253_s3 + $0x20] sm:$0xf] }
  0x19   :  { %412 = vmatpush.bf16.msrb.mxu0 %v1708_v42  ;;  %488 = vmatpush.bf16.msrb.mxu2 %v1720_v46  ;;  %v1418_v26 = vld [vmem:[%s2253_s3 + $0x28] sm:$0xf0]  ;;  %v1840_v27 = vld [vmem:[%s2251_s1] sm:$0xff]  ;;  %v1263_v33 = vld [vmem:[%s2253_s3 + $0xc] sm:$0xf0] }
  0x1a   :  { %170 = vmatpush.bf16.msra.mxu1 %v1230_v4  ;;  %v1413_v29 = vld [vmem:[%s2253_s3 + $0x4] sm:$0xf]  ;;  %v1847_v31 = vor.u32 %v1418_v26, %v1281_v25  ;;  %v1269_v34 = vld [vmem:[%s2253_s3 + $0x8] sm:$0xf]  ;;  %v1415_v35 = vld [vmem:[%s2253_s3 + $0x10] sm:$0xf0]  ;;  %v255_v36 = vpack.c.bf16 %v1840_v27, %v1840_v27 }
  0x1b   :  { %v1864_v37 = vor.u32 %v1415_v35, %v1269_v34  ;;  %v1867_v40 = vor.u32 %v1413_v29, %v1263_v33  ;;  %v61_v41 = vld [vmem:[%s2254_s4] ss:$2 sm:$0x7] }
  0x1c   :  { %387 = vmatpush.bf16.msrb.mxu3 %v1699_v39  ;;  %v63_v43 = vperm.slane %v61_v41, 0  ;;  %v1964_v11 = vperm.slane %v61_v41, 1 }
  0x1d   :  { %413 = vmatpush.bf16.msrb.mxu0 %v1747_v55  ;;  %489 = vmatpush.bf16.msrb.mxu2 %v1754_v58 }
  0x1e   :  { %473 = vmatpush.bf16.msrb.mxu1 %v1616_v13 }
  0x1f   :  { %1258 = vmatmul.msk.bf16.gmra.mxu3 %vm121_vm0, %v1745_v54  ;;  %1256 = vmatmul.msk.bf16.gmra.mxu2 %vm121_vm0, %v1752_v57 }
  0x20   :  { %388 = vmatpush.bf16.msrb.mxu3 %v1723_v47  ;;  %1248 = vmatmul.msk.bf16.gmra.mxu0 %vm121_vm0, %v1752_v57 }
  0x21   :  { %490 = vmatpush.bf16.msrb.mxu2 %v1779_v3  ;;  %414 = vmatpush.bf16.msrb.mxu0 %v1796_v10 }
  0x22   :  { %1251 = vmatmul.msk.bf16.vlgmr.msra.gmra.mxu1 %vm121_vm0, %v1632_v18  ;;  %v1842_v18 = vor.u32 %v1416_v22, %v1275_v23 }
  0x23   :  { %474 = vmatpush.bf16.msrb.mxu1 %v1635_v19 }
  0x24   :  { %389 = vmatpush.bf16.msrb.mxu3 %v1757_v60 }
  0x25   :  { %491 = vmatpush.bf16.msrb.mxu2 %v1813_v16  ;;  %415 = vmatpush.bf16.msrb.mxu0 %v1815_v20 }
  0x27   :  { %475 = vmatpush.bf16.msrb.mxu1 %v1672_v30 }
  0x28   :  { %390 = vmatpush.bf16.msrb.mxu3 %v1788_v7 }
  0x29   :  { %492 = vmatpush.bf16.msrb.mxu2 %v1842_v18  ;;  %416 = vmatpush.bf16.msrb.mxu0 %v1847_v31 }
  0x2b   :  { %476 = vmatpush.bf16.msrb.mxu1 %v1699_v39 }
  0x2c   :  { %391 = vmatpush.bf16.msrb.mxu3 %v1818_v21 }
  0x2d   :  { %493 = vmatpush.bf16.msrb.mxu2 %v1867_v40  ;;  %417 = vmatpush.bf16.msrb.mxu0 %v1864_v37 }
  0x2f   :  { %392 = vmatmul.bf16.vlgmr.msrb.gmra.mxu3 %v255_v36  ;;  %477 = vmatpush.bf16.msrb.mxu1 %v1723_v47 }
  0x30   :  { %397 = vmatpush.bf16.msra.mxu3 %v1666_v28  ;;  %1249 = vmatmul.msk.bf16.gmra.mxu0 %vm121_vm0, %v1627_v17 }
  0x31   :  { %561 = vmatpush.bf16.msra.mxu0 %v1616_v13  ;;  %587 = vmatpush.bf16.msra.mxu2 %v1649_v24 }
  0x32   :  { %1252 = vmatmul.msk.bf16.gmra.mxu1 %vm121_vm0, %v1752_v57 }
  0x33   :  { %478 = vmatpush.bf16.msrb.mxu1 %v1757_v60 }
  0x34   :  { %398 = vmatpush.bf16.msra.mxu3 %v1696_v38 }
  0x35   :  { %562 = vmatpush.bf16.msra.mxu0 %v1635_v19  ;;  %588 = vmatpush.bf16.msra.mxu2 %v1678_v32 }
  0x37   :  { %479 = vmatpush.bf16.msrb.mxu1 %v1788_v7 }
  0x38   :  { %399 = vmatpush.bf16.msra.mxu3 %v1720_v46 }
  0x39   :  { %563 = vmatpush.bf16.msra.mxu0 %v1672_v30  ;;  %589 = vmatpush.bf16.msra.mxu2 %v1708_v42 }
  0x3b   :  { %480 = vmatpush.bf16.msrb.mxu1 %v1818_v21 }
  0x3c   :  { %400 = vmatpush.bf16.msra.mxu3 %v1754_v58 }
  0x3d   :  { %564 = vmatpush.bf16.msra.mxu0 %v1699_v39  ;;  %590 = vmatpush.bf16.msra.mxu2 %v1747_v55 }
  0x3f   :  { %574 = vmatpush.bf16.msra.mxu1 %v1666_v28 }
  0x40   :  { %401 = vmatpush.bf16.msra.mxu3 %v1779_v3  ;;  %1250 = vmatmul.msk.bf16.gmra.mxu0 %vm121_vm0, %v1745_v54 }
  0x41   :  { %565 = vmatpush.bf16.msra.mxu0 %v1723_v47  ;;  %591 = vmatpush.bf16.msra.mxu2 %v1796_v10 }
  0x42   :  { %1253 = vmatmul.msk.bf16.gmra.mxu1 %vm121_vm0, %v1627_v17 }
  0x43   :  { %575 = vmatpush.bf16.msra.mxu1 %v1696_v38 }
  0x44   :  { %402 = vmatpush.bf16.msra.mxu3 %v1813_v16 }
  0x45   :  { %566 = vmatpush.bf16.msra.mxu0 %v1757_v60  ;;  %592 = vmatpush.bf16.msra.mxu2 %v1815_v20 }
  0x47   :  { %576 = vmatpush.bf16.msra.mxu1 %v1720_v46 }
  0x48   :  { %403 = vmatpush.bf16.msra.mxu3 %v1842_v18 }
  0x49   :  { %567 = vmatpush.bf16.msra.mxu0 %v1788_v7  ;;  %593 = vmatpush.bf16.msra.mxu2 %v1847_v31 }
  0x4b   :  { %577 = vmatpush.bf16.msra.mxu1 %v1754_v58 }
  0x4c   :  { %404 = vmatpush.bf16.msra.mxu3 %v1867_v40 }
  0x4d   :  { %568 = vmatpush.bf16.msra.mxu0 %v1818_v21  ;;  %594 = vmatpush.bf16.msra.mxu2 %v1864_v37 }
  0x4f   :  { %405 = vmatmul.bf16.vlgmr.msra.gmra.mxu3 %v255_v36  ;;  %578 = vmatpush.bf16.msra.mxu1 %v1779_v3 }
  0x50   :  { %499 = vmatpush.bf16.msrb.mxu3 %v1649_v24  ;;  %418 = vmatmul.bf16.vlgmr.msrb.gmra.mxu0 %v255_v36 }
  0x51   :  { %662 = vmatpush.bf16.msrb.mxu0 %v1666_v28 }
  0x52   :  { %1254 = vmatmul.msk.bf16.gmra.mxu1 %vm121_vm0, %v1745_v54 }
  0x53   :  { %579 = vmatpush.bf16.msra.mxu1 %v1813_v16 }
  0x54   :  { %500 = vmatpush.bf16.msrb.mxu3 %v1678_v32 }
  0x55   :  { %663 = vmatpush.bf16.msrb.mxu0 %v1696_v38 }
  0x57   :  { %580 = vmatpush.bf16.msra.mxu1 %v1842_v18 }
  0x58   :  { %501 = vmatpush.bf16.msrb.mxu3 %v1708_v42 }
  0x59   :  { %664 = vmatpush.bf16.msrb.mxu0 %v1720_v46 }
  0x5b   :  { %581 = vmatpush.bf16.msra.mxu1 %v1867_v40 }
  0x5c   :  { %502 = vmatpush.bf16.msrb.mxu3 %v1747_v55 }
  0x5d   :  { %665 = vmatpush.bf16.msrb.mxu0 %v1754_v58 }
  0x60   :  { %503 = vmatpush.bf16.msrb.mxu3 %v1796_v10 }
  0x61   :  { %666 = vmatpush.bf16.msrb.mxu0 %v1779_v3 }
  0x64   :  { %504 = vmatpush.bf16.msrb.mxu3 %v1815_v20 }
  0x65   :  { %667 = vmatpush.bf16.msrb.mxu0 %v1813_v16 }
  0x68   :  { %505 = vmatpush.bf16.msrb.mxu3 %v1847_v31 }
  0x69   :  { %668 = vmatpush.bf16.msrb.mxu0 %v1842_v18 }
  0x6c   :  { %506 = vmatpush.bf16.msrb.mxu3 %v1864_v37 }
  0x6d   :  { %669 = vmatpush.bf16.msrb.mxu0 %v1867_v40 }
  0x70   :  { %649 = vmatpush.bf16.msra.mxu3 %v1616_v13 }
  0x74   :  { %650 = vmatpush.bf16.msra.mxu3 %v1635_v19 }
  0x78   :  { %651 = vmatpush.bf16.msra.mxu3 %v1672_v30 }
  0x7c   :  { %652 = vmatpush.bf16.msra.mxu3 %v1699_v39 }
  0x80   :  { %653 = vmatpush.bf16.msra.mxu3 %v1723_v47 }
  0x84   :  { %654 = vmatpush.bf16.msra.mxu3 %v1757_v60 }
  0x88   :  { %655 = vmatpush.bf16.msra.mxu3 %v1788_v7 }
  0x8c   :  { %656 = vmatpush.bf16.msra.mxu3 %v1818_v21 }
  0x8d   :  { %v143_v17 = vpop.f32.mrf.mxu0 }
  0x8e   :  { %v144_v61 = vadd.f32 %v143_v17, %v63_v43 }
  0x92   :  { %v1944_v44 = vpop.f32.mrf.mxu3 }
  0x95   :  { %v145_v45 = vpop.f32.mrf.mxu0 }
  0x96   :  { %v1946_v48 = vadd.f32 %v145_v45, %v63_v43 }
  0x9a   :  { %v1948_v49 = vpop.f32.mrf.mxu3 }
  0x9d   :  { %v148_v50 = vpop.f32.mrf.mxu0 }
  0x9e   :  { %v1950_v51 = vadd.f32 %v148_v50, %v63_v43 }
  0x9f   :  { %v172_v22 = vpop.f32.mrf.mxu1 }
  0xa0   :  { %v173_v25 = vadd.f32 %v172_v22, %v1964_v11 }
  0xa2   :  { %v1952_v52 = vpop.f32.mrf.mxu3 }
  0xa3   :  { %2259 = vst [vmem:[#allocation5_spill] sm:$0xff] %v1952_v52 }
  0xa5   :  { %v150_v53 = vpop.f32.mrf.mxu0 }
  0xa6   :  { %v1954_v54 = vadd.f32 %v150_v53, %v63_v43 }
  0xaa   :  { %v1956_v56 = vpop.f32.mrf.mxu3 }
  0xab   :  { %2260 = vst [vmem:[#allocation6_spill] sm:$0xff] %v1956_v56 }
  0xad   :  { %v153_v57 = vpop.f32.mrf.mxu0 }
  0xae   :  { %v1958_v59 = vadd.f32 %v153_v57, %v63_v43 }
  0xb2   :  { %v393_v62 = vpop.f32.mrf.mxu3 }
  0xb3   :  { %v423_v63 = vadd.f32 %v393_v62, %v144_v61 }
  0xb5   :  { %v1355_v0 = vmul.f32 -1.442695, %v423_v63  ;;  %v155_v1 = vpop.f32.mrf.mxu0 }
  0xb6   :  { %v1960_v2 = vadd.f32 %v155_v1, %v63_v43 }
  0xb7   :  { %1452 = vpow2.f32 %v1355_v0 }
  0xba   :  { %v395_v4 = vpop.f32.mrf.mxu3 }
  0xbd   :  { %v1453_v5 = vpop.eup %1452  ;;  %v158_v6 = vpop.f32.mrf.mxu0 }
  0xbe   :  { %v431_v8 = vadd.f32 1.0, %v1453_v5  ;;  %v1962_v9 = vadd.f32 %v158_v6, %v63_v43  ;;  %v201_v5 = vpop.f32.mrf.mxu2  ;;  %v1975_v6 = vperm.slane %v61_v41, 2 }
  0xc0   :  { %2261 = vst [vmem:[#allocation7_spill] sm:$0xff] %v1962_v9  ;;  %1454 = vrcp.f32 %v431_v8  ;;  %v444_v50 = vand.u32 2147483648, %v431_v8  ;;  %vm438_vm2 = vweird.f32 %v431_v8  ;;  %v442_v57 = vand.u32 2147483647, %v431_v8 }
  0xc2   :  { %v445_v0 = vor.u32 1.1754944e-38, %v444_v50  ;;  %vm443_vm4 = vcmp.eq.f32.partialorder %v442_v57, 8.507059e+37 }
  0xc5   :  { %v160_v12 = vpop.f32.mrf.mxu0 }
  0xc6   :  { %v1455_v14 = vpop.eup %1454  ;;  %v1966_v15 = vadd.f32 %v160_v12, %v63_v43  ;;  %v1972_v43 = vld [vmem:[%s2254_s4 + $0x5] ss:$0 sm:$0xff] }
  0xc7   :  { %v434_v23 = vmul.f32 %v1455_v14, %v431_v8  ;;  %vm439_vm1 = vweird.f32 %v1455_v14  ;;  %v202_v8 = vadd.f32 %v201_v5, %v1975_v6 }
  0xc8   :  { %2262 = vst [vmem:[#allocation8_spill] sm:$0xff] %v1966_v15  ;;  %vm440_vm3 = vmor %vm438_vm2, %vm439_vm1 }
  0xc9   :  { %v435_v29 = vsub.f32 1.0, %v434_v23 }
  0xcb   :  { %v436_v36 = vmul.f32 %v1455_v14, %v435_v29 }
  0xcd   :  { %v419_v34 = vpop.f32.mrf.mxu0  ;;  %v437_v17 = vadd.f32 %v1455_v14, %v436_v36 }
  0xce   :  { %v464_v1 = vadd.f32 %v1972_v43, %v419_v34 }
  0xcf   :  { %v441_v63 = vsel %vm440_vm3, %v1455_v14, %v437_v17 }
  0xd0   :  { %v446_v4 = vsel %vm443_vm4, %v445_v0, %v441_v63 }
  0xd1   :  { %v465_v12 = vmul.f32 %v464_v1, %v446_v4  ;;  %v203_v4 = vpop.f32.mrf.mxu2 }
  0xd2   :  { %v406_v26 = vpop.f32.mrf.mxu3 }
  0xd3   :  { %v424_v33 = vadd.f32 %v406_v26, %v173_v25  ;;  %v466_v25 = vadd.f32 %v465_v12, %v202_v8 }
  0xd5   :  { %v1356_v35 = vmul.f32 -1.442695, %v424_v33  ;;  %v421_v53 = vpop.f32.mrf.mxu0 }
  0xd7   :  { %1456 = vpow2.f32 %v1356_v35 }
  0xd9   :  { %v2017_v12 = vpop.f32.mrf.mxu2 }
  0xda   :  { %v408_v45 = vpop.f32.mrf.mxu3 }
  0xdd   :  { %v1457_v61 = vpop.eup %1456 }
  0xde   :  { %v432_v62 = vadd.f32 1.0, %v1457_v61 }
  0xe0   :  { %1458 = vrcp.f32 %v432_v62  ;;  %v459_v29 = vand.u32 2147483648, %v432_v62  ;;  %v457_v14 = vand.u32 2147483647, %v432_v62  ;;  %vm453_vm6 = vweird.f32 %v432_v62 }
  0xe1   :  { %1460 = vtanh.f32 %v466_v25 }
  0xe2   :  { %v460_v34 = vor.u32 1.1754944e-38, %v459_v29  ;;  %vm458_vm8 = vcmp.eq.f32.partialorder %v457_v14, 8.507059e+37 }
  0xe6   :  { %v1459_v22 = vpop.eup %1458 }
  0xe7   :  { %v449_v23 = vmul.f32 %v1459_v22, %v432_v62  ;;  %vm454_vm5 = vweird.f32 %v1459_v22  ;;  %v1461_v45 = vpop.eup %1460 }
  0xe8   :  { %vm455_vm7 = vmor %vm453_vm6, %vm454_vm5 }
  0xe9   :  { %v450_v26 = vsub.f32 1.0, %v449_v23 }
  0xeb   :  { %v451_v33 = vmul.f32 %v1459_v22, %v450_v26 }
  0xed   :  { %v452_v35 = vadd.f32 %v1459_v22, %v451_v33 }
  0xef   :  { %v456_v36 = vsel %vm455_vm7, %v1459_v22, %v452_v35  ;;  %v2021_v22 = vpop.f32.mrf.mxu2 }
  0xf0   :  { %v461_v41 = vsel %vm458_vm8, %v460_v34, %v456_v36 }
  0xf1   :  { %v468_v17 = vsub.f32 1.0, %v461_v41  ;;  %v470_v53 = vmul.f32 %v461_v41, %v1840_v27  ;;  %v174_v27 = vpop.f32.mrf.mxu1 }
  0xf2   :  { %v175_v29 = vadd.f32 %v174_v27, %v1964_v11 }
  0xf3   :  { %v469_v50 = vmul.f32 %v1461_v45, %v468_v17 }
  0xf5   :  { %v1979_v57 = vadd.f32 %v470_v53, %v469_v50 }
  0xf7   :  { %v472_v61 = vpack.c.bf16 %v1979_v57, %v1979_v57 }
  0xf9   :  { %481 = vmatmul.bf16.vlgmr.msrb.gmra.mxu1 %v472_v61  ;;  %494 = vmatmul.bf16.vlgmr.msrb.gmra.mxu2 %v472_v61  ;;  %v2007_v62 = vpop.f32.mrf.mxu1 }
  0xfa   :  { %507 = vmatmul.bf16.vlgmr.msrb.gmra.mxu3 %v472_v61  ;;  %675 = vmatpush.bf16.msrb.mxu1 %v1649_v24 }
  0xfb   :  { %737 = vmatpush.bf16.msrb.mxu2 %v1616_v13  ;;  %750 = vmatpush.bf16.msrb.mxu3 %v1666_v28 }
  0xfe   :  { %676 = vmatpush.bf16.msrb.mxu1 %v1678_v32 }
  0xff   :  { %738 = vmatpush.bf16.msrb.mxu2 %v1635_v19  ;;  %751 = vmatpush.bf16.msrb.mxu3 %v1696_v38 }
 0x101   :  { %v2009_v63 = vpop.f32.mrf.mxu1 }
 0x102   :  { %677 = vmatpush.bf16.msrb.mxu1 %v1708_v42 }
 0x103   :  { %739 = vmatpush.bf16.msrb.mxu2 %v1672_v30  ;;  %752 = vmatpush.bf16.msrb.mxu3 %v1720_v46 }
 0x106   :  { %678 = vmatpush.bf16.msrb.mxu1 %v1747_v55 }
 0x107   :  { %740 = vmatpush.bf16.msrb.mxu2 %v1699_v39  ;;  %753 = vmatpush.bf16.msrb.mxu3 %v1754_v58 }
 0x109   :  { %v2011_v0 = vpop.f32.mrf.mxu1 }
 0x10a   :  { %679 = vmatpush.bf16.msrb.mxu1 %v1796_v10 }
 0x10b   :  { %741 = vmatpush.bf16.msrb.mxu2 %v1723_v47  ;;  %754 = vmatpush.bf16.msrb.mxu3 %v1779_v3 }
 0x10e   :  { %680 = vmatpush.bf16.msrb.mxu1 %v1815_v20 }
 0x10f   :  { %742 = vmatpush.bf16.msrb.mxu2 %v1757_v60  ;;  %755 = vmatpush.bf16.msrb.mxu3 %v1813_v16 }
 0x111   :  { %v2013_v1 = vpop.f32.mrf.mxu1 }
 0x112   :  { %681 = vmatpush.bf16.msrb.mxu1 %v1847_v31 }
 0x113   :  { %743 = vmatpush.bf16.msrb.mxu2 %v1788_v7  ;;  %756 = vmatpush.bf16.msrb.mxu3 %v1842_v18 }
 0x116   :  { %682 = vmatpush.bf16.msrb.mxu1 %v1864_v37 }
 0x117   :  { %744 = vmatpush.bf16.msrb.mxu2 %v1818_v21  ;;  %757 = vmatpush.bf16.msrb.mxu3 %v1867_v40 }
 0x119   :  { %v2015_v5 = vpop.f32.mrf.mxu1 }
 0x121   :  { %v2019_v8 = vpop.f32.mrf.mxu1 }
 0x122   :  { %2263 = vst [vmem:[#allocation9_spill] sm:$0xff] %v2019_v8 }
 0x176   :  { %v482_v23 = vpop.f32.mrf.mxu1 }
 0x177   :  { %v512_v25 = vadd.f32 %v482_v23, %v1946_v48 }
 0x179   :  { %v1357_v26 = vmul.f32 -1.442695, %v512_v25 }
 0x17b   :  { %1462 = vpow2.f32 %v1357_v26 }
 0x17c   :  { %v495_v33 = vpop.f32.mrf.mxu2 }
 0x17d   :  { %v513_v14 = vadd.f32 %v495_v33, %v175_v29  ;;  %v508_v35 = vpop.f32.mrf.mxu3 }
 0x17e   :  { %v484_v34 = vpop.f32.mrf.mxu1 }
 0x17f   :  { %v1358_v36 = vmul.f32 -1.442695, %v513_v14 }
 0x181   :  { %v1463_v41 = vpop.eup %1462  ;;  %1464 = vpow2.f32 %v1358_v36 }
 0x182   :  { %v520_v17 = vadd.f32 1.0, %v1463_v41 }
 0x184   :  { %1466 = vrcp.f32 %v520_v17  ;;  %v497_v45 = vpop.f32.mrf.mxu2  ;;  %v533_v25 = vand.u32 2147483648, %v520_v17  ;;  %v531_v26 = vand.u32 2147483647, %v520_v17  ;;  %vm527_vm10 = vweird.f32 %v520_v17 }
 0x185   :  { %v510_v50 = vpop.f32.mrf.mxu3  ;;  %v552_v45 = vadd.f32 %v1972_v43, %v508_v35 }
 0x186   :  { %v534_v14 = vor.u32 1.1754944e-38, %v533_v25  ;;  %vm532_vm12 = vcmp.eq.f32.partialorder %v531_v26, 8.507059e+37  ;;  %v204_v50 = vadd.f32 %v203_v4, %v1975_v6 }
 0x187   :  { %v1465_v53 = vpop.eup %1464 }
 0x188   :  { %v521_v61 = vadd.f32 1.0, %v1465_v53 }
 0x18a   :  { %v1467_v56 = vpop.eup %1466  ;;  %1468 = vrcp.f32 %v521_v61  ;;  %v546_v8 = vand.u32 2147483647, %v521_v61  ;;  %vm542_vm14 = vweird.f32 %v521_v61 }
 0x18b   :  { %v523_v48 = vmul.f32 %v1467_v56, %v520_v17  ;;  %vm528_vm9 = vweird.f32 %v1467_v56 }
 0x18c   :  { %vm529_vm11 = vmor %vm527_vm10, %vm528_vm9  ;;  %vm547_vm0 = vcmp.eq.f32.partialorder %v546_v8, 8.507059e+37 }
 0x18d   :  { %v524_v23 = vsub.f32 1.0, %v523_v48  ;;  %v548_v48 = vand.u32 2147483648, %v521_v61 }
 0x18f   :  { %v525_v27 = vmul.f32 %v1467_v56, %v524_v23  ;;  %v549_v17 = vor.u32 1.1754944e-38, %v548_v48 }
 0x190   :  { %v1469_v29 = vpop.eup %1468 }
 0x191   :  { %v538_v33 = vmul.f32 %v1469_v29, %v521_v61  ;;  %v526_v34 = vadd.f32 %v1467_v56, %v525_v27  ;;  %vm543_vm13 = vweird.f32 %v1469_v29 }
 0x192   :  { %vm544_vm15 = vmor %vm542_vm14, %vm543_vm13 }
 0x193   :  { %v539_v36 = vsub.f32 1.0, %v538_v33  ;;  %v530_v41 = vsel %vm529_vm11, %v1467_v56, %v526_v34 }
 0x194   :  { %v535_v53 = vsel %vm532_vm12, %v534_v14, %v530_v41 }
 0x195   :  { %v540_v15 = vmul.f32 %v1469_v29, %v539_v36  ;;  %v553_v23 = vmul.f32 %v552_v45, %v535_v53 }
 0x197   :  { %v541_v52 = vadd.f32 %v1469_v29, %v540_v15  ;;  %v554_v9 = vadd.f32 %v553_v23, %v204_v50 }
 0x199   :  { %v545_v27 = vsel %vm544_vm15, %v1469_v29, %v541_v52  ;;  %1470 = vtanh.f32 %v554_v9  ;;  %v178_v52 = vadd.f32 %v2007_v62, %v1964_v11 }
 0x19a   :  { %v550_v56 = vsel %vm547_vm0, %v549_v17, %v545_v27 }
 0x19b   :  { %v556_v25 = vsub.f32 1.0, %v550_v56  ;;  %v558_v4 = vmul.f32 %v550_v56, %v1979_v57 }
 0x19f   :  { %v1471_v26 = vpop.eup %1470 }
 0x1a0   :  { %v557_v35 = vmul.f32 %v1471_v26, %v556_v25 }
 0x1a2   :  { %v2028_v33 = vadd.f32 %v558_v4, %v557_v35 }
 0x1a4   :  { %v560_v34 = vpack.c.bf16 %v2028_v33, %v2028_v33 }
 0x1a6   :  { %569 = vmatmul.bf16.vlgmr.msra.gmra.mxu0 %v560_v34  ;;  %582 = vmatmul.bf16.vlgmr.msra.gmra.mxu1 %v560_v34 }
 0x1a7   :  { %595 = vmatmul.bf16.vlgmr.msra.gmra.mxu2 %v560_v34  ;;  %763 = vmatpush.bf16.msra.mxu0 %v1649_v24 }
 0x1a8   :  { %825 = vmatpush.bf16.msra.mxu1 %v1616_v13  ;;  %838 = vmatpush.bf16.msra.mxu2 %v1666_v28 }
 0x1ab   :  { %764 = vmatpush.bf16.msra.mxu0 %v1678_v32 }
 0x1ac   :  { %826 = vmatpush.bf16.msra.mxu1 %v1635_v19  ;;  %839 = vmatpush.bf16.msra.mxu2 %v1696_v38 }
 0x1af   :  { %765 = vmatpush.bf16.msra.mxu0 %v1708_v42 }
 0x1b0   :  { %827 = vmatpush.bf16.msra.mxu1 %v1672_v30  ;;  %840 = vmatpush.bf16.msra.mxu2 %v1720_v46 }
 0x1b3   :  { %766 = vmatpush.bf16.msra.mxu0 %v1747_v55 }
 0x1b4   :  { %828 = vmatpush.bf16.msra.mxu1 %v1699_v39  ;;  %841 = vmatpush.bf16.msra.mxu2 %v1754_v58 }
 0x1b7   :  { %767 = vmatpush.bf16.msra.mxu0 %v1796_v10 }
 0x1b8   :  { %829 = vmatpush.bf16.msra.mxu1 %v1723_v47  ;;  %842 = vmatpush.bf16.msra.mxu2 %v1779_v3 }
 0x1bb   :  { %768 = vmatpush.bf16.msra.mxu0 %v1815_v20 }
 0x1bc   :  { %830 = vmatpush.bf16.msra.mxu1 %v1757_v60  ;;  %843 = vmatpush.bf16.msra.mxu2 %v1813_v16 }
 0x1bf   :  { %769 = vmatpush.bf16.msra.mxu0 %v1847_v31 }
 0x1c0   :  { %831 = vmatpush.bf16.msra.mxu1 %v1788_v7  ;;  %844 = vmatpush.bf16.msra.mxu2 %v1842_v18 }
 0x1c3   :  { %770 = vmatpush.bf16.msra.mxu0 %v1864_v37 }
 0x1c4   :  { %832 = vmatpush.bf16.msra.mxu1 %v1818_v21  ;;  %845 = vmatpush.bf16.msra.mxu2 %v1867_v40 }
 0x223   :  { %v570_v9 = vpop.f32.mrf.mxu0  ;;  %v583_v15 = vpop.f32.mrf.mxu1 }
 0x224   :  { %v600_v8 = vadd.f32 %v570_v9, %v1950_v51  ;;  %v601_v61 = vadd.f32 %v583_v15, %v178_v52 }
 0x226   :  { %v1359_v29 = vmul.f32 -1.442695, %v600_v8  ;;  %v1360_v14 = vmul.f32 -1.442695, %v601_v61 }
 0x228   :  { %1472 = vpow2.f32 %v1359_v29 }
 0x229   :  { %1474 = vpow2.f32 %v1360_v14 }
 0x22a   :  { %v596_v36 = vpop.f32.mrf.mxu2 }
 0x22b   :  { %v572_v41 = vpop.f32.mrf.mxu0  ;;  %v585_v45 = vpop.f32.mrf.mxu1  ;;  %v640_v61 = vadd.f32 %v1972_v43, %v596_v36 }
 0x22c   :  { %v207_v41 = vadd.f32 %v2017_v12, %v1975_v6 }
 0x22e   :  { %v1473_v50 = vpop.eup %1472 }
 0x22f   :  { %v1475_v53 = vpop.eup %1474  ;;  %v608_v48 = vadd.f32 1.0, %v1473_v50 }
 0x230   :  { %v609_v23 = vadd.f32 1.0, %v1475_v53 }
 0x231   :  { %1476 = vrcp.f32 %v608_v48  ;;  %v621_v35 = vand.u32 2147483648, %v608_v48  ;;  %v619_v34 = vand.u32 2147483647, %v608_v48  ;;  %vm615_vm2 = vweird.f32 %v608_v48 }
 0x232   :  { %1478 = vrcp.f32 %v609_v23  ;;  %v598_v17 = vpop.f32.mrf.mxu2  ;;  %v636_v45 = vand.u32 2147483648, %v609_v23  ;;  %vm630_vm6 = vweird.f32 %v609_v23  ;;  %v634_v53 = vand.u32 2147483647, %v609_v23 }
 0x233   :  { %v622_v15 = vor.u32 1.1754944e-38, %v621_v35  ;;  %vm620_vm4 = vcmp.eq.f32.partialorder %v619_v34, 8.507059e+37 }
 0x234   :  { %vm635_vm8 = vcmp.eq.f32.partialorder %v634_v53, 8.507059e+37 }
 0x237   :  { %v1477_v62 = vpop.eup %1476 }
 0x238   :  { %v1479_v27 = vpop.eup %1478  ;;  %v611_v56 = vmul.f32 %v1477_v62, %v608_v48  ;;  %vm616_vm1 = vweird.f32 %v1477_v62  ;;  %v637_v48 = vor.u32 1.1754944e-38, %v636_v45 }
 0x239   :  { %v626_v25 = vmul.f32 %v1479_v27, %v609_v23  ;;  %vm617_vm3 = vmor %vm615_vm2, %vm616_vm1  ;;  %vm631_vm5 = vweird.f32 %v1479_v27  ;;  %v180_v23 = vadd.f32 %v2009_v63, %v1964_v11 }
 0x23a   :  { %v612_v51 = vsub.f32 1.0, %v611_v56  ;;  %vm632_vm7 = vmor %vm630_vm6, %vm631_vm5 }
 0x23b   :  { %v627_v26 = vsub.f32 1.0, %v626_v25 }
 0x23c   :  { %v613_v4 = vmul.f32 %v1477_v62, %v612_v51 }
 0x23d   :  { %v628_v52 = vmul.f32 %v1479_v27, %v627_v26 }
 0x23e   :  { %v614_v9 = vadd.f32 %v1477_v62, %v613_v4 }
 0x23f   :  { %v629_v29 = vadd.f32 %v1479_v27, %v628_v52 }
 0x240   :  { %v618_v8 = vsel %vm617_vm3, %v1477_v62, %v614_v9 }
 0x241   :  { %v623_v14 = vsel %vm620_vm4, %v622_v15, %v618_v8  ;;  %v633_v56 = vsel %vm632_vm7, %v1479_v27, %v629_v29 }
 0x242   :  { %v641_v50 = vmul.f32 %v640_v61, %v623_v14  ;;  %v638_v62 = vsel %vm635_vm8, %v637_v48, %v633_v56 }
 0x243   :  { %v644_v25 = vsub.f32 1.0, %v638_v62  ;;  %v646_v26 = vmul.f32 %v638_v62, %v2028_v33 }
 0x244   :  { %v642_v17 = vadd.f32 %v641_v50, %v207_v41 }
 0x246   :  { %1480 = vtanh.f32 %v642_v17 }
 0x24c   :  { %v1481_v51 = vpop.eup %1480 }
 0x24d   :  { %v645_v36 = vmul.f32 %v1481_v51, %v644_v25 }
 0x24f   :  { %v2063_v35 = vadd.f32 %v646_v26, %v645_v36 }
 0x251   :  { %v648_v12 = vpack.c.bf16 %v2063_v35, %v2063_v35 }
 0x253   :  { %657 = vmatmul.bf16.vlgmr.msra.gmra.mxu3 %v648_v12  ;;  %670 = vmatmul.bf16.vlgmr.msrb.gmra.mxu0 %v648_v12 }
 0x254   :  { %683 = vmatmul.bf16.vlgmr.msrb.gmra.mxu1 %v648_v12  ;;  %851 = vmatpush.bf16.msra.mxu3 %v1649_v24 }
 0x255   :  { %913 = vmatpush.bf16.msrb.mxu0 %v1616_v13  ;;  %926 = vmatpush.bf16.msrb.mxu1 %v1666_v28 }
 0x258   :  { %852 = vmatpush.bf16.msra.mxu3 %v1678_v32 }
 0x259   :  { %914 = vmatpush.bf16.msrb.mxu0 %v1635_v19  ;;  %927 = vmatpush.bf16.msrb.mxu1 %v1696_v38 }
 0x25c   :  { %853 = vmatpush.bf16.msra.mxu3 %v1708_v42 }
 0x25d   :  { %915 = vmatpush.bf16.msrb.mxu0 %v1672_v30  ;;  %928 = vmatpush.bf16.msrb.mxu1 %v1720_v46 }
 0x260   :  { %854 = vmatpush.bf16.msra.mxu3 %v1747_v55 }
 0x261   :  { %916 = vmatpush.bf16.msrb.mxu0 %v1699_v39  ;;  %929 = vmatpush.bf16.msrb.mxu1 %v1754_v58 }
 0x264   :  { %855 = vmatpush.bf16.msra.mxu3 %v1796_v10 }
 0x265   :  { %917 = vmatpush.bf16.msrb.mxu0 %v1723_v47  ;;  %930 = vmatpush.bf16.msrb.mxu1 %v1779_v3 }
 0x268   :  { %856 = vmatpush.bf16.msra.mxu3 %v1815_v20 }
 0x269   :  { %918 = vmatpush.bf16.msrb.mxu0 %v1757_v60  ;;  %931 = vmatpush.bf16.msrb.mxu1 %v1813_v16 }
 0x26c   :  { %857 = vmatpush.bf16.msra.mxu3 %v1847_v31 }
 0x26d   :  { %919 = vmatpush.bf16.msrb.mxu0 %v1788_v7  ;;  %932 = vmatpush.bf16.msrb.mxu1 %v1842_v18 }
 0x270   :  { %858 = vmatpush.bf16.msra.mxu3 %v1864_v37 }
 0x271   :  { %920 = vmatpush.bf16.msrb.mxu0 %v1818_v21  ;;  %933 = vmatpush.bf16.msrb.mxu1 %v1867_v40 }
 0x2d0   :  { %v671_v27 = vpop.f32.mrf.mxu0 }
 0x2d1   :  { %v689_v4 = vadd.f32 %v671_v27, %v180_v23  ;;  %v684_v34 = vpop.f32.mrf.mxu1 }
 0x2d2   :  { %v728_v27 = vadd.f32 %v1972_v43, %v684_v34 }
 0x2d3   :  { %v1362_v52 = vmul.f32 -1.442695, %v689_v4 }
 0x2d5   :  { %1482 = vpow2.f32 %v1362_v52 }
 0x2d6   :  { %v658_v9 = vpop.f32.mrf.mxu3 }
 0x2d7   :  { %v688_v15 = vadd.f32 %v658_v9, %v1954_v54 }
 0x2d8   :  { %v673_v8 = vpop.f32.mrf.mxu0 }
 0x2d9   :  { %v1361_v61 = vmul.f32 -1.442695, %v688_v15  ;;  %v686_v29 = vpop.f32.mrf.mxu1  ;;  %v209_v15 = vadd.f32 %v2021_v22, %v1975_v6 }
 0x2db   :  { %v1483_v14 = vpop.eup %1482  ;;  %1484 = vpow2.f32 %v1361_v61 }
 0x2dc   :  { %v697_v41 = vadd.f32 1.0, %v1483_v14 }
 0x2de   :  { %v660_v45 = vpop.f32.mrf.mxu3  ;;  %1486 = vrcp.f32 %v697_v41  ;;  %v724_v8 = vand.u32 2147483648, %v697_v41  ;;  %vm718_vm14 = vweird.f32 %v697_v41  ;;  %v722_v29 = vand.u32 2147483647, %v697_v41 }
 0x2e0   :  { %vm723_vm0 = vcmp.eq.f32.partialorder %v722_v29, 8.507059e+37 }
 0x2e1   :  { %v1485_v50 = vpop.eup %1484 }
 0x2e2   :  { %v696_v53 = vadd.f32 1.0, %v1485_v50  ;;  %v725_v50 = vor.u32 1.1754944e-38, %v724_v8 }
 0x2e4   :  { %1488 = vrcp.f32 %v696_v53  ;;  %v1487_v63 = vpop.eup %1486  ;;  %v709_v51 = vand.u32 2147483648, %v696_v53  ;;  %v707_v54 = vand.u32 2147483647, %v696_v53  ;;  %vm703_vm10 = vweird.f32 %v696_v53 }
 0x2e5   :  { %v714_v17 = vmul.f32 %v1487_v63, %v697_v41  ;;  %vm719_vm13 = vweird.f32 %v1487_v63 }
 0x2e6   :  { %v710_v23 = vor.u32 1.1754944e-38, %v709_v51  ;;  %vm708_vm12 = vcmp.eq.f32.partialorder %v707_v54, 8.507059e+37  ;;  %vm720_vm15 = vmor %vm718_vm14, %vm719_vm13 }
 0x2e7   :  { %v715_v62 = vsub.f32 1.0, %v714_v17 }
 0x2e9   :  { %v716_v26 = vmul.f32 %v1487_v63, %v715_v62 }
 0x2ea   :  { %v1489_v56 = vpop.eup %1488 }
 0x2eb   :  { %v699_v48 = vmul.f32 %v1489_v56, %v696_v53  ;;  %vm704_vm9 = vweird.f32 %v1489_v56  ;;  %v717_v52 = vadd.f32 %v1487_v63, %v716_v26 }
 0x2ec   :  { %vm705_vm11 = vmor %vm703_vm10, %vm704_vm9 }
 0x2ed   :  { %v700_v25 = vsub.f32 1.0, %v699_v48  ;;  %v721_v45 = vsel %vm720_vm15, %v1487_v63, %v717_v52 }
 0x2ee   :  { %v726_v53 = vsel %vm723_vm0, %v725_v50, %v721_v45 }
 0x2ef   :  { %v701_v36 = vmul.f32 %v1489_v56, %v700_v25  ;;  %v732_v34 = vsub.f32 1.0, %v726_v53  ;;  %v734_v48 = vmul.f32 %v726_v53, %v2063_v35 }
 0x2f1   :  { %v702_v12 = vadd.f32 %v1489_v56, %v701_v36 }
 0x2f3   :  { %v706_v4 = vsel %vm705_vm11, %v1489_v56, %v702_v12 }
 0x2f4   :  { %v711_v9 = vsel %vm708_vm12, %v710_v23, %v706_v4 }
 0x2f5   :  { %v729_v61 = vmul.f32 %v728_v27, %v711_v9 }
 0x2f7   :  { %v730_v14 = vadd.f32 %v729_v61, %v209_v15  ;;  %v212_v15 = vadd.f32 %v1944_v44, %v1975_v6 }
 0x2f9   :  { %1490 = vtanh.f32 %v730_v14 }
 0x2ff   :  { %v1491_v17 = vpop.eup %1490 }
 0x300   :  { %v733_v56 = vmul.f32 %v1491_v17, %v732_v34 }
 0x302   :  { %v2098_v62 = vadd.f32 %v734_v48, %v733_v56 }
 0x304   :  { %v736_v22 = vpack.c.bf16 %v2098_v62, %v2098_v62 }
 0x306   :  { %745 = vmatmul.bf16.vlgmr.msrb.gmra.mxu2 %v736_v22  ;;  %758 = vmatmul.bf16.vlgmr.msrb.gmra.mxu3 %v736_v22 }
 0x307   :  { %771 = vmatmul.bf16.vlgmr.msra.gmra.mxu0 %v736_v22  ;;  %939 = vmatpush.bf16.msrb.mxu2 %v1649_v24 }
 0x308   :  { %1001 = vmatpush.bf16.msrb.mxu3 %v1616_v13  ;;  %1014 = vmatpush.bf16.msra.mxu0 %v1666_v28 }
 0x30b   :  { %940 = vmatpush.bf16.msrb.mxu2 %v1678_v32 }
 0x30c   :  { %1002 = vmatpush.bf16.msrb.mxu3 %v1635_v19  ;;  %1015 = vmatpush.bf16.msra.mxu0 %v1696_v38  ;;  %v183_v19 = vadd.f32 %v2011_v0, %v1964_v11 }
 0x30f   :  { %941 = vmatpush.bf16.msrb.mxu2 %v1708_v42 }
 0x310   :  { %1003 = vmatpush.bf16.msrb.mxu3 %v1672_v30  ;;  %1016 = vmatpush.bf16.msra.mxu0 %v1720_v46 }
 0x313   :  { %942 = vmatpush.bf16.msrb.mxu2 %v1747_v55 }
 0x314   :  { %1004 = vmatpush.bf16.msrb.mxu3 %v1699_v39  ;;  %1017 = vmatpush.bf16.msra.mxu0 %v1754_v58 }
 0x317   :  { %943 = vmatpush.bf16.msrb.mxu2 %v1796_v10 }
 0x318   :  { %1005 = vmatpush.bf16.msrb.mxu3 %v1723_v47  ;;  %1018 = vmatpush.bf16.msra.mxu0 %v1779_v3 }
 0x31b   :  { %944 = vmatpush.bf16.msrb.mxu2 %v1815_v20 }
 0x31c   :  { %1006 = vmatpush.bf16.msrb.mxu3 %v1757_v60  ;;  %1019 = vmatpush.bf16.msra.mxu0 %v1813_v16 }
 0x31f   :  { %945 = vmatpush.bf16.msrb.mxu2 %v1847_v31 }
 0x320   :  { %1007 = vmatpush.bf16.msrb.mxu3 %v1788_v7  ;;  %1020 = vmatpush.bf16.msra.mxu0 %v1842_v18 }
 0x323   :  { %946 = vmatpush.bf16.msrb.mxu2 %v1864_v37 }
 0x324   :  { %1008 = vmatpush.bf16.msrb.mxu3 %v1818_v21  ;;  %1021 = vmatpush.bf16.msra.mxu0 %v1867_v40 }
 0x384   :  { %v772_v13 = vpop.f32.mrf.mxu0 }
 0x385   :  { %v816_v27 = vadd.f32 %v1972_v43, %v772_v13 }
 0x389   :  { %v746_v28 = vpop.f32.mrf.mxu2  ;;  %v759_v30 = vpop.f32.mrf.mxu3 }
 0x38a   :  { %v776_v38 = vadd.f32 %v746_v28, %v1958_v59  ;;  %v777_v39 = vadd.f32 %v759_v30, %v183_v19  ;;  %v1444_v19 = vld [vmem:[%s2255_s5 + $0x38] sm:$0xff]  ;;  %v1442_v28 = vld [vmem:[%s2255_s5 + $0x28] sm:$0xff]  ;;  %v1441_v30 = vld [vmem:[%s2255_s5 + $0x20] sm:$0xff] }
 0x38c   :  { %v1363_v46 = vmul.f32 -1.442695, %v776_v38  ;;  %v1364_v47 = vmul.f32 -1.442695, %v777_v39  ;;  %v774_v58 = vpop.f32.mrf.mxu0 }
 0x38e   :  { %1492 = vpow2.f32 %v1363_v46 }
 0x38f   :  { %1494 = vpow2.f32 %v1364_v47  ;;  %v1440_v47 = vld [vmem:[%s2255_s5 + $0x18] sm:$0xff] }
 0x391   :  { %v748_v60 = vpop.f32.mrf.mxu2  ;;  %v761_v3 = vpop.f32.mrf.mxu3 }
 0x392   :  { %v1439_v3 = vld [vmem:[%s2255_s5 + $0x10] sm:$0xff] }
 0x394   :  { %v1493_v7 = vpop.eup %1492 }
 0x395   :  { %v1495_v16 = vpop.eup %1494  ;;  %v784_v21 = vadd.f32 1.0, %v1493_v7 }
 0x396   :  { %v785_v18 = vadd.f32 1.0, %v1495_v16 }
 0x397   :  { %1496 = vrcp.f32 %v784_v21  ;;  %v797_v59 = vand.u32 2147483648, %v784_v21  ;;  %v795_v54 = vand.u32 2147483647, %v784_v21  ;;  %vm791_vm2 = vweird.f32 %v784_v21 }
 0x398   :  { %1498 = vrcp.f32 %v785_v18  ;;  %v812_v61 = vand.u32 2147483648, %v785_v18  ;;  %vm806_vm6 = vweird.f32 %v785_v18  ;;  %v810_v29 = vand.u32 2147483647, %v785_v18 }
 0x399   :  { %v798_v23 = vor.u32 1.1754944e-38, %v797_v59  ;;  %vm796_vm4 = vcmp.eq.f32.partialorder %v795_v54, 8.507059e+37 }
 0x39a   :  { %v813_v50 = vor.u32 1.1754944e-38, %v812_v61  ;;  %vm811_vm8 = vcmp.eq.f32.partialorder %v810_v29, 8.507059e+37 }
 0x39d   :  { %v1497_v40 = vpop.eup %1496 }
 0x39e   :  { %v1499_v0 = vpop.eup %1498  ;;  %v787_v41 = vmul.f32 %v1497_v40, %v784_v21  ;;  %vm792_vm1 = vweird.f32 %v1497_v40  ;;  %v1438_v21 = vld [vmem:[%s2255_s5 + $0x8] sm:$0xff] }
 0x39f   :  { %v802_v63 = vmul.f32 %v1499_v0, %v785_v18  ;;  %vm793_vm3 = vmor %vm791_vm2, %vm792_vm1  ;;  %vm807_vm5 = vweird.f32 %v1499_v0 }
 0x3a0   :  { %v788_v25 = vsub.f32 1.0, %v787_v41  ;;  %vm808_vm7 = vmor %vm806_vm6, %vm807_vm5 }
 0x3a1   :  { %v803_v51 = vsub.f32 1.0, %v802_v63 }
 0x3a2   :  { %v789_v36 = vmul.f32 %v1497_v40, %v788_v25  ;;  %v1437_v25 = vld [vmem:[%s2255_s5] sm:$0xff] }
 0x3a3   :  { %v804_v26 = vmul.f32 %v1499_v0, %v803_v51 }
 0x3a4   :  { %v790_v12 = vadd.f32 %v1497_v40, %v789_v36 }
 0x3a5   :  { %v805_v9 = vadd.f32 %v1499_v0, %v804_v26 }
 0x3a6   :  { %v794_v4 = vsel %vm793_vm3, %v1497_v40, %v790_v12 }
 0x3a7   :  { %v799_v52 = vsel %vm796_vm4, %v798_v23, %v794_v4  ;;  %v809_v45 = vsel %vm808_vm7, %v1499_v0, %v805_v9  ;;  %v214_v23 = vadd.f32 %v1948_v49, %v1975_v6 }
 0x3a8   :  { %v817_v8 = vmul.f32 %v816_v27, %v799_v52  ;;  %v814_v53 = vsel %vm811_vm8, %v813_v50, %v809_v45 }
 0x3a9   :  { %v820_v34 = vsub.f32 1.0, %v814_v53  ;;  %v822_v48 = vmul.f32 %v814_v53, %v2098_v62 }
 0x3aa   :  { %v818_v14 = vadd.f32 %v817_v8, %v212_v15 }
 0x3ac   :  { %1500 = vtanh.f32 %v818_v14 }
 0x3b2   :  { %v1501_v17 = vpop.eup %1500 }
 0x3b3   :  { %v821_v56 = vmul.f32 %v1501_v17, %v820_v34 }
 0x3b5   :  { %v2133_v22 = vadd.f32 %v822_v48, %v821_v56  ;;  %v1089_v56 = vpack.c.bf16 %v2028_v33, %v1979_v57  ;;  %v1090_v48 = vpack.c.bf16 %v2098_v62, %v2063_v35 }
 0x3b7   :  { %v824_v44 = vpack.c.bf16 %v2133_v22, %v2133_v22 }
 0x3b9   :  { %833 = vmatmul.bf16.vlgmr.msra.gmra.mxu1 %v824_v44  ;;  %846 = vmatmul.bf16.vlgmr.msra.gmra.mxu2 %v824_v44 }
 0x3ba   :  { %859 = vmatmul.bf16.vlgmr.msra.gmra.mxu3 %v824_v44  ;;  %1027 = vmatpush.bf16.msra.mxu1 %v1649_v24 }
 0x3bb   :  { %1161 = vmatpush.bf16.msra.mxu2 %v1444_v19 }
 0x3be   :  { %1028 = vmatpush.bf16.msra.mxu1 %v1678_v32 }
 0x3c2   :  { %1029 = vmatpush.bf16.msra.mxu1 %v1708_v42  ;;  %v1443_v42 = vld [vmem:[%s2255_s5 + $0x30] sm:$0xff] }
 0x3c3   :  { %1162 = vmatpush.bf16.msra.mxu2 %v1443_v42 }
 0x3c6   :  { %1030 = vmatpush.bf16.msra.mxu1 %v1747_v55  ;;  %v185_v55 = vadd.f32 %v2013_v1, %v1964_v11 }
 0x3c7   :  { %1163 = vmatpush.bf16.msra.mxu2 %v1442_v28 }
 0x3ca   :  { %1031 = vmatpush.bf16.msra.mxu1 %v1796_v10 }
 0x3cb   :  { %1164 = vmatpush.bf16.msra.mxu2 %v1441_v30 }
 0x3ce   :  { %1032 = vmatpush.bf16.msra.mxu1 %v1815_v20 }
 0x3cf   :  { %1165 = vmatpush.bf16.msra.mxu2 %v1440_v47 }
 0x3d2   :  { %1033 = vmatpush.bf16.msra.mxu1 %v1847_v31 }
 0x3d3   :  { %1166 = vmatpush.bf16.msra.mxu2 %v1439_v3 }
 0x3d6   :  { %1034 = vmatpush.bf16.msra.mxu1 %v1864_v37 }
 0x3d7   :  { %1167 = vmatpush.bf16.msra.mxu2 %v1438_v21 }
 0x3db   :  { %1168 = vmatpush.bf16.msra.mxu2 %v1437_v25 }
 0x436   :  { %v834_v13 = vpop.f32.mrf.mxu1 }
 0x437   :  { %v864_v24 = vadd.f32 %v834_v13, %v1960_v2  ;;  %v188_v13 = vadd.f32 %v2015_v5, %v1964_v11 }
 0x439   :  { %v1365_v32 = vmul.f32 -1.442695, %v864_v24 }
 0x43b   :  { %1502 = vpow2.f32 %v1365_v32  ;;  %v2264_v32 = vld [vmem:[#allocation7_spill] sm:$0xff] }
 0x43c   :  { %v847_v10 = vpop.f32.mrf.mxu2 }
 0x43d   :  { %v865_v20 = vadd.f32 %v847_v10, %v185_v55  ;;  %v860_v31 = vpop.f32.mrf.mxu3 }
 0x43e   :  { %v836_v37 = vpop.f32.mrf.mxu1  ;;  %v904_v12 = vadd.f32 %v1972_v43, %v860_v31 }
 0x43f   :  { %v1366_v2 = vmul.f32 -1.442695, %v865_v20 }
 0x441   :  { %v1503_v38 = vpop.eup %1502  ;;  %1504 = vpow2.f32 %v1366_v2  ;;  %v2192_v2 = vld [vmem:[%s2256_s6] ss:$0 sm:$0xff] }
 0x442   :  { %v872_v39 = vadd.f32 1.0, %v1503_v38 }
 0x444   :  { %1506 = vrcp.f32 %v872_v39  ;;  %v849_v1 = vpop.f32.mrf.mxu2  ;;  %v885_v40 = vand.u32 2147483648, %v872_v39  ;;  %v883_v41 = vand.u32 2147483647, %v872_v39  ;;  %vm879_vm10 = vweird.f32 %v872_v39 }
 0x445   :  { %v862_v46 = vpop.f32.mrf.mxu3 }
 0x446   :  { %v886_v36 = vor.u32 1.1754944e-38, %v885_v40  ;;  %vm884_vm12 = vcmp.eq.f32.partialorder %v883_v41, 8.507059e+37 }
 0x447   :  { %v1505_v58 = vpop.eup %1504 }
 0x448   :  { %v873_v60 = vadd.f32 1.0, %v1505_v58 }
 0x44a   :  { %v1507_v7 = vpop.eup %1506  ;;  %1508 = vrcp.f32 %v873_v60  ;;  %v900_v52 = vand.u32 2147483648, %v873_v60  ;;  %v898_v15 = vand.u32 2147483647, %v873_v60  ;;  %vm894_vm14 = vweird.f32 %v873_v60 }
 0x44b   :  { %v875_v16 = vmul.f32 %v1507_v7, %v872_v39  ;;  %vm880_vm9 = vweird.f32 %v1507_v7 }
 0x44c   :  { %vm881_vm11 = vmor %vm879_vm10, %vm880_vm9  ;;  %v901_v29 = vor.u32 1.1754944e-38, %v900_v52  ;;  %vm899_vm0 = vcmp.eq.f32.partialorder %v898_v15, 8.507059e+37 }
 0x44d   :  { %v876_v18 = vsub.f32 1.0, %v875_v16 }
 0x44f   :  { %v877_v0 = vmul.f32 %v1507_v7, %v876_v18 }
 0x450   :  { %v1509_v63 = vpop.eup %1508 }
 0x451   :  { %v890_v59 = vmul.f32 %v1509_v63, %v873_v60  ;;  %v878_v51 = vadd.f32 %v1507_v7, %v877_v0  ;;  %vm895_vm13 = vweird.f32 %v1509_v63  ;;  %v2201_v0 = vld [vmem:[%s2254_s4 + $0x5] ss:$0 sm:$0xff] }
 0x452   :  { %vm896_vm15 = vmor %vm894_vm14, %vm895_vm13 }
 0x453   :  { %v891_v54 = vsub.f32 1.0, %v890_v59  ;;  %v882_v26 = vsel %vm881_vm11, %v1507_v7, %v878_v51  ;;  %v2265_v59 = vld [vmem:[#allocation5_spill] sm:$0xff] }
 0x454   :  { %v887_v27 = vsel %vm884_vm12, %v886_v36, %v882_v26  ;;  %v217_v51 = vadd.f32 %v2265_v59, %v1975_v6 }
 0x455   :  { %v892_v4 = vmul.f32 %v1509_v63, %v891_v54  ;;  %v905_v9 = vmul.f32 %v904_v12, %v887_v27 }
 0x457   :  { %v893_v8 = vadd.f32 %v1509_v63, %v892_v4  ;;  %v906_v61 = vadd.f32 %v905_v9, %v214_v23 }
 0x459   :  { %v897_v14 = vsel %vm896_vm15, %v1509_v63, %v893_v8  ;;  %1510 = vtanh.f32 %v906_v61 }
 0x45a   :  { %v902_v45 = vsel %vm899_vm0, %v901_v29, %v897_v14 }
 0x45b   :  { %v908_v43 = vsub.f32 1.0, %v902_v45  ;;  %v910_v49 = vmul.f32 %v902_v45, %v2133_v22 }
 0x45f   :  { %v1511_v50 = vpop.eup %1510 }
 0x460   :  { %v909_v53 = vmul.f32 %v1511_v50, %v908_v43 }
 0x462   :  { %v2176_v34 = vadd.f32 %v910_v49, %v909_v53 }
 0x464   :  { %v912_v17 = vpack.c.bf16 %v2176_v34, %v2176_v34  ;;  %v1091_v44 = vpack.c.bf16 %v2176_v34, %v2133_v22 }
 0x466   :  { %921 = vmatmul.bf16.vlgmr.msrb.gmra.mxu0 %v912_v17  ;;  %934 = vmatmul.bf16.vlgmr.msrb.gmra.mxu1 %v912_v17 }
 0x467   :  { %947 = vmatmul.bf16.vlgmr.msrb.gmra.mxu2 %v912_v17 }
 0x477   :  { %1169 = vmatmul.bf16.vlgmr.msra.gmra.mxu2 %v1089_v56 }
 0x487   :  { %1174 = vmatmul.bf16.gmra.mxu2 %v1090_v48 }
 0x497   :  { %1179 = vmatmul.bf16.gmra.mxu2 %v1091_v44  ;;  %v2266_v44 = vld [vmem:[#allocation9_spill] sm:$0xff] }
 0x4e3   :  { %v922_v19 = vpop.f32.mrf.mxu0  ;;  %v935_v24 = vpop.f32.mrf.mxu1 }
 0x4e4   :  { %v952_v42 = vadd.f32 %v922_v19, %v2264_v32  ;;  %v953_v55 = vadd.f32 %v935_v24, %v188_v13  ;;  %v190_v13 = vadd.f32 %v2266_v44, %v1964_v11 }
 0x4e6   :  { %v1367_v10 = vmul.f32 -1.442695, %v952_v42  ;;  %v1368_v20 = vmul.f32 -1.442695, %v953_v55 }
 0x4e8   :  { %1512 = vpow2.f32 %v1367_v10  ;;  %v2267_v10 = vld [vmem:[#allocation8_spill] sm:$0xff] }
 0x4e9   :  { %1514 = vpow2.f32 %v1368_v20 }
 0x4ea   :  { %v948_v57 = vpop.f32.mrf.mxu2 }
 0x4eb   :  { %v924_v33 = vpop.f32.mrf.mxu0  ;;  %v937_v35 = vpop.f32.mrf.mxu1  ;;  %v992_v41 = vadd.f32 %v2201_v0, %v948_v57 }
 0x4ee   :  { %v1513_v62 = vpop.eup %1512 }
 0x4ef   :  { %v1515_v31 = vpop.eup %1514  ;;  %v960_v37 = vadd.f32 1.0, %v1513_v62 }
 0x4f0   :  { %v961_v22 = vadd.f32 1.0, %v1515_v31 }
 0x4f1   :  { %1516 = vrcp.f32 %v960_v37  ;;  %v973_v58 = vand.u32 2147483648, %v960_v37  ;;  %v971_v7 = vand.u32 2147483647, %v960_v37  ;;  %vm967_vm2 = vweird.f32 %v960_v37 }
 0x4f2   :  { %1518 = vrcp.f32 %v961_v22  ;;  %v950_v28 = vpop.f32.mrf.mxu2  ;;  %v988_v36 = vand.u32 2147483648, %v961_v22  ;;  %vm982_vm6 = vweird.f32 %v961_v22  ;;  %v986_v12 = vand.u32 2147483647, %v961_v22 }
 0x4f3   :  { %v974_v18 = vor.u32 1.1754944e-38, %v973_v58  ;;  %vm972_vm4 = vcmp.eq.f32.partialorder %v971_v7, 8.507059e+37 }
 0x4f4   :  { %v989_v52 = vor.u32 1.1754944e-38, %v988_v36  ;;  %vm987_vm8 = vcmp.eq.f32.partialorder %v986_v12, 8.507059e+37 }
 0x4f7   :  { %v1517_v5 = vpop.eup %1516 }
 0x4f8   :  { %v1519_v30 = vpop.eup %1518  ;;  %v963_v38 = vmul.f32 %v1517_v5, %v960_v37  ;;  %vm968_vm1 = vweird.f32 %v1517_v5 }
 0x4f9   :  { %v978_v39 = vmul.f32 %v1519_v30, %v961_v22  ;;  %vm969_vm3 = vmor %vm967_vm2, %vm968_vm1  ;;  %vm983_vm5 = vweird.f32 %v1519_v30 }
 0x4fa   :  { %v964_v1 = vsub.f32 1.0, %v963_v38  ;;  %v1170_v46 = vpop.f32.mrf.mxu2  ;;  %vm984_vm7 = vmor %vm982_vm6, %vm983_vm5 }
 0x4fb   :  { %v979_v47 = vsub.f32 1.0, %v978_v39  ;;  %v1171_v60 = vadd.f32 %v2192_v2, %v1170_v46 }
 0x4fc   :  { %v965_v3 = vmul.f32 %v1517_v5, %v964_v1 }
 0x4fd   :  { %v980_v16 = vmul.f32 %v1519_v30, %v979_v47  ;;  %1190 = vst [vmem:[%s2257_s7] sm:$0xff] %v1171_v60 }
 0x4fe   :  { %v966_v21 = vadd.f32 %v1517_v5, %v965_v3 }
 0x4ff   :  { %v981_v63 = vadd.f32 %v1519_v30, %v980_v16 }
 0x500   :  { %v970_v40 = vsel %vm969_vm3, %v1517_v5, %v966_v21 }
 0x501   :  { %v975_v25 = vsel %vm972_vm4, %v974_v18, %v970_v40  ;;  %v985_v4 = vsel %vm984_vm7, %v1519_v30, %v981_v63 }
 0x502   :  { %v993_v54 = vmul.f32 %v992_v41, %v975_v25  ;;  %v1172_v26 = vpop.f32.mrf.mxu2  ;;  %v990_v9 = vsel %vm987_vm8, %v989_v52, %v985_v4  ;;  %v2268_v41 = vld [vmem:[#allocation6_spill] sm:$0xff] }
 0x503   :  { %v1173_v23 = vadd.f32 %v2192_v2, %v1172_v26  ;;  %v996_v8 = vsub.f32 1.0, %v990_v9  ;;  %v998_v45 = vmul.f32 %v990_v9, %v2176_v34  ;;  %v219_v63 = vadd.f32 %v2268_v41, %v1975_v6 }
 0x504   :  { %v994_v27 = vadd.f32 %v993_v54, %v217_v51 }
 0x505   :  { %1191 = vst [vmem:[%s2257_s7 + $0x8] sm:$0xff] %v1173_v23 }
 0x506   :  { %1520 = vtanh.f32 %v994_v27 }
 0x50a   :  { %v1175_v15 = vpop.f32.mrf.mxu2 }
 0x50b   :  { %v1176_v61 = vadd.f32 %v2192_v2, %v1175_v15 }
 0x50c   :  { %v1521_v29 = vpop.eup %1520 }
 0x50d   :  { %v997_v14 = vmul.f32 %v1521_v29, %v996_v8  ;;  %1192 = vst [vmem:[%s2257_s7 + $0x10] sm:$0xff] %v1176_v61 }
 0x50f   :  { %v2215_v43 = vadd.f32 %v998_v45, %v997_v14 }
 0x511   :  { %v1000_v50 = vpack.c.bf16 %v2215_v43, %v2215_v43 }
 0x512   :  { %v1177_v53 = vpop.f32.mrf.mxu2 }
 0x513   :  { %v1178_v49 = vadd.f32 %v2192_v2, %v1177_v53  ;;  %1009 = vmatmul.bf16.vlgmr.msrb.gmra.mxu3 %v1000_v50  ;;  %1022 = vmatmul.bf16.vlgmr.msra.gmra.mxu0 %v1000_v50 }
 0x514   :  { %1035 = vmatmul.bf16.vlgmr.msra.gmra.mxu1 %v1000_v50 }
 0x515   :  { %1193 = vst [vmem:[%s2257_s7 + $0x18] sm:$0xff] %v1178_v49 }
 0x51a   :  { %v1180_v17 = vpop.f32.mrf.mxu2 }
 0x51b   :  { %v1181_v56 = vadd.f32 %v2192_v2, %v1180_v17 }
 0x51d   :  { %1194 = vst [vmem:[%s2257_s7 + $0x20] sm:$0xff] %v1181_v56 }
 0x522   :  { %v1182_v34 = vpop.f32.mrf.mxu2 }
 0x523   :  { %v1183_v48 = vadd.f32 %v2192_v2, %v1182_v34 }
 0x525   :  { %1195 = vst [vmem:[%s2257_s7 + $0x28] sm:$0xff] %v1183_v48 }
 0x590   :  { %v1023_v19 = vpop.f32.mrf.mxu0 }
 0x591   :  { %v1041_v24 = vadd.f32 %v1023_v19, %v190_v13  ;;  %v1036_v32 = vpop.f32.mrf.mxu1 }
 0x592   :  { %v1080_v16 = vadd.f32 %v2201_v0, %v1036_v32 }
 0x593   :  { %v1370_v42 = vmul.f32 -1.442695, %v1041_v24 }
 0x595   :  { %1522 = vpow2.f32 %v1370_v42 }
 0x596   :  { %v1010_v55 = vpop.f32.mrf.mxu3 }
 0x597   :  { %v1040_v20 = vadd.f32 %v1010_v55, %v2267_v10 }
 0x598   :  { %v1025_v57 = vpop.f32.mrf.mxu0 }
 0x599   :  { %v1369_v33 = vmul.f32 -1.442695, %v1040_v20  ;;  %v1038_v35 = vpop.f32.mrf.mxu1 }
 0x59b   :  { %v1523_v62 = vpop.eup %1522  ;;  %1524 = vpow2.f32 %v1369_v33 }
 0x59c   :  { %v1049_v31 = vadd.f32 1.0, %v1523_v62 }
 0x59e   :  { %v1012_v37 = vpop.f32.mrf.mxu3  ;;  %1526 = vrcp.f32 %v1049_v31  ;;  %v1076_v25 = vand.u32 2147483648, %v1049_v31  ;;  %vm1070_vm14 = vweird.f32 %v1049_v31  ;;  %v1074_v51 = vand.u32 2147483647, %v1049_v31 }
 0x5a0   :  { %v1077_v26 = vor.u32 1.1754944e-38, %v1076_v25  ;;  %vm1075_vm0 = vcmp.eq.f32.partialorder %v1074_v51, 8.507059e+37 }
 0x5a1   :  { %v1525_v22 = vpop.eup %1524 }
 0x5a2   :  { %v1048_v28 = vadd.f32 1.0, %v1525_v22 }
 0x5a4   :  { %1528 = vrcp.f32 %v1048_v28  ;;  %v1527_v11 = vpop.eup %1526  ;;  %v1061_v46 = vand.u32 2147483648, %v1048_v28  ;;  %v1059_v58 = vand.u32 2147483647, %v1048_v28  ;;  %vm1055_vm10 = vweird.f32 %v1048_v28 }
 0x5a5   :  { %v1066_v5 = vmul.f32 %v1527_v11, %v1049_v31  ;;  %vm1071_vm13 = vweird.f32 %v1527_v11 }
 0x5a6   :  { %v1062_v7 = vor.u32 1.1754944e-38, %v1061_v46  ;;  %vm1060_vm12 = vcmp.eq.f32.partialorder %v1059_v58, 8.507059e+37  ;;  %vm1072_vm15 = vmor %vm1070_vm14, %vm1071_vm13 }
 0x5a7   :  { %v1067_v39 = vsub.f32 1.0, %v1066_v5 }
 0x5a9   :  { %v1068_v60 = vmul.f32 %v1527_v11, %v1067_v39 }
 0x5aa   :  { %v1529_v30 = vpop.eup %1528 }
 0x5ab   :  { %v1051_v38 = vmul.f32 %v1529_v30, %v1048_v28  ;;  %vm1056_vm9 = vweird.f32 %v1529_v30  ;;  %v1069_v40 = vadd.f32 %v1527_v11, %v1068_v60 }
 0x5ac   :  { %vm1057_vm11 = vmor %vm1055_vm10, %vm1056_vm9 }
 0x5ad   :  { %v1052_v1 = vsub.f32 1.0, %v1051_v38  ;;  %v1073_v54 = vsel %vm1072_vm15, %v1527_v11, %v1069_v40 }
 0x5ae   :  { %v1078_v12 = vsel %vm1075_vm0, %v1077_v26, %v1073_v54 }
 0x5af   :  { %v1053_v47 = vmul.f32 %v1529_v30, %v1052_v1  ;;  %v1084_v0 = vsub.f32 1.0, %v1078_v12  ;;  %v1086_v4 = vmul.f32 %v1078_v12, %v2215_v43 }
 0x5b1   :  { %v1054_v3 = vadd.f32 %v1529_v30, %v1053_v47 }
 0x5b3   :  { %v1058_v21 = vsel %vm1057_vm11, %v1529_v30, %v1054_v3 }
 0x5b4   :  { %v1063_v18 = vsel %vm1060_vm12, %v1062_v7, %v1058_v21 }
 0x5b5   :  { %v1081_v59 = vmul.f32 %v1080_v16, %v1063_v18 }
 0x5b7   :  { %v1082_v36 = vadd.f32 %v1081_v59, %v219_v63 }
 0x5b9   :  { %1530 = vtanh.f32 %v1082_v36 }
 0x5bf   :  { %v1531_v23 = vpop.eup %1530 }
 0x5c0   :  { %v1085_v27 = vmul.f32 %v1531_v23, %v1084_v0 }
 0x5c2   :  { %v1087_v52 = vadd.f32 %v1086_v4, %v1085_v27 }
 0x5c4   :  { %1088 = vst [vmem:[%s2258_s8] sm:$0xff] %v1087_v52  ;;  %v1092_v6 = vpack.c.bf16 %v1087_v52, %v2215_v43 }
 0x5c6   :  { %1184 = vmatmul.bf16.gmra.mxu2 %v1092_v6 }
 0x649   :  { %v1185_v9 = vpop.f32.mrf.mxu2 }
 0x64a   :  { %v1186_v15 = vadd.f32 %v2192_v2, %v1185_v9 }
 0x64c   :  { %1196 = vst [vmem:[%s2257_s7 + $0x30] sm:$0xff] %v1186_v15 }
 0x651   :  { %v1187_v8 = vpop.f32.mrf.mxu2 }
 0x652   :  { %v1188_v61 = vadd.f32 %v2192_v2, %v1187_v8 }
 0x654   :  { %1197 = vst [vmem:[%s2257_s7 + $0x38] sm:$0xff] %v1188_v61 }
 0x655   :  { %1206 = vsyncpa [#allocation3], 1 }

</bundles_post_ra>
